<compile_context>
chip_gen: v7x
topology: tpu7x:2x2x1
jax: 0.10.0
libtpu: 0.0.40
codegen_flags: <defaults>
</compile_context>

<pallas_src>
import numpy as np
import jax
import jax.numpy as jnp
from jax import lax
from jax.experimental import pallas as pl
from jax.experimental.pallas import tpu as pltpu

# ----------------------------- module "params" ------------------------------
ANCHORS = [(10, 14), (23, 27), (37, 58), (81, 82), (135, 169), (344, 319)]
NUM_CLASSES = 3
IMG_SIZE = (256, 256)
IGNORE_THRESHOLD = 0.5
LAMBDA_CONF = 1.0
LAMBDA_CLS = 1.0
LAMBDA_LOC = 1.0
BCE_LOG_CLAMP = -100.0  # PyTorch nn.BCELoss clamps log() at -100

ATTRS = 5 + NUM_CLASSES          # pred rows: x, y, w, h, conf, cls[0..C)
# packed target-slab row layout
TBOX_R = 0                       # 4 rows: tx, ty, tw, th
TCLS_R = 4                       # C rows: one-hot class targets
OBJ_R = 4 + NUM_CLASSES          # 1 row : obj_mask
COOD_R = 5 + NUM_CLASSES         # 1 row : coodn_mask  (== tconf by construction)
BLS_R = 6 + NUM_CLASSES          # 1 row : 2 - box_loss_scale_x * box_loss_scale_y
TROWS = 7 + NUM_CLASSES


# ------------------------------ host-side glue ------------------------------
def _sigmoid_np(x):
    return 1.0 / (1.0 + np.exp(-x))


def _jaccard_np(box_a_xywh, box_b_xywh):
    """Pairwise IoU of xywh boxes (T,4) x (N,4) -> (T,N)."""
    a = np.concatenate([box_a_xywh[:, :2] - box_a_xywh[:, 2:4] / 2.0,
                        box_a_xywh[:, :2] + box_a_xywh[:, 2:4] / 2.0], axis=1)
    b = np.concatenate([box_b_xywh[:, :2] - box_b_xywh[:, 2:4] / 2.0,
                        box_b_xywh[:, :2] + box_b_xywh[:, 2:4] / 2.0], axis=1)
    max_xy = np.minimum(a[:, None, 2:4], b[None, :, 2:4])
    min_xy = np.maximum(a[:, None, 0:2], b[None, :, 0:2])
    inter_wh = np.clip(max_xy - min_xy, 0.0, None)
    inter = inter_wh[..., 0] * inter_wh[..., 1]
    area_a = ((a[:, 2] - a[:, 0]) * (a[:, 3] - a[:, 1]))[:, None]
    area_b = ((b[:, 2] - b[:, 0]) * (b[:, 3] - b[:, 1]))[None, :]
    union = area_a + area_b - inter
    return inter / union


def _bbox_iou_corners_np(box1, box2):
    """IoU between box1 (1,4) and box2 (K,4), corner format."""
    ix1 = np.maximum(box1[:, 0], box2[:, 0])
    iy1 = np.maximum(box1[:, 1], box2[:, 1])
    ix2 = np.minimum(box1[:, 2], box2[:, 2])
    iy2 = np.minimum(box1[:, 3], box2[:, 3])
    inter = np.clip(ix2 - ix1, 0.0, None) * np.clip(iy2 - iy1, 0.0, None)
    a1 = (box1[:, 2] - box1[:, 0]) * (box1[:, 3] - box1[:, 1])
    a2 = (box2[:, 2] - box2[:, 0]) * (box2[:, 3] - box2[:, 1])
    return inter / (a1 + a2 - inter + 1e-16)


def build_target_np(prediction, targets, anchors, num_classes, img_size,
                    in_w, in_h, ignore_threshold):
    """Faithful numpy port of YOLOTinyLoss.build_target (iou_loss_mode='l2')."""
    bs, A = prediction.shape[0], prediction.shape[1]
    scaled_anchors_total = np.array(
        [(aw / img_size[0], ah / img_size[1]) for aw, ah in anchors],
        dtype=np.float32)
    feature_length = [img_size[0] // 32, img_size[0] // 16]
    anchor_index = [[0, 1, 2], [3, 4, 5]][feature_length.index(in_w)]
    scaled_anchors = scaled_anchors_total[anchor_index]

    obj_mask = np.ones((bs, A, in_h, in_w), np.float32)
    coodn_mask = np.zeros((bs, A, in_h, in_w), np.float32)
    tx = np.zeros((bs, A, in_h, in_w), np.float32)
    ty = np.zeros((bs, A, in_h, in_w), np.float32)
    tw = np.zeros((bs, A, in_h, in_w), np.float32)
    th = np.zeros((bs, A, in_h, in_w), np.float32)
    tconf = np.zeros((bs, A, in_h, in_w), np.float32)
    tcls = np.zeros((bs, A, in_h, in_w, num_classes), np.float32)
    bls_x = np.zeros((bs, A, in_h, in_w), np.float32)
    bls_y = np.zeros((bs, A, in_h, in_w), np.float32)

    x = _sigmoid_np(prediction[..., 0])
    y = _sigmoid_np(prediction[..., 1])
    w = prediction[..., 2]
    h = prediction[..., 3]
    grid_x = np.tile(np.arange(in_w, dtype=np.float32), (in_h, 1))[None, None]
    grid_y = np.tile(np.arange(in_h, dtype=np.float32).reshape(-1, 1),
                     (1, in_w))[None, None]
    anchor_w = scaled_anchors[:, 0].reshape(1, A, 1, 1)
    anchor_h = scaled_anchors[:, 1].reshape(1, A, 1, 1)
    pred_boxes = np.stack([(x + grid_x) / in_w,
                           (y + grid_y) / in_h,
                           np.exp(w) * anchor_w,
                           np.exp(h) * anchor_h], axis=-1).astype(np.float32)

    # ignore-threshold suppression of obj_mask (vectorized over targets)
    for i in range(bs):
        pb = pred_boxes[i].reshape(-1, 4)
        tb = targets[i][targets[i][:, 4] != -1]
        if len(tb) > 0:
            gt_box = tb[:, :4].astype(np.float32)
            anch_ious = _jaccard_np(gt_box, pb)                     # (T, A*H*W)
            supp = (anch_ious > ignore_threshold).any(axis=0)
            obj_mask[i][supp.reshape(A, in_h, in_w)] = 0.0

    # positive assignment (data-dependent scatter, stays on host)
    anchor_shapes = np.concatenate(
        [np.zeros((len(anchors), 2), np.float32), scaled_anchors_total.copy()],
        axis=1)
    anchor_shapes[:, 2] *= in_w
    anchor_shapes[:, 3] *= in_h
    for b in range(bs):
        tb = targets[b][targets[b][:, 4] != -1]
        for t in range(tb.shape[0]):
            gx = tb[t, 0] * in_w
            gy = tb[t, 1] * in_h
            gw = tb[t, 2] * in_w
            gh = tb[t, 3] * in_h
            gi = int(gx)
            gj = int(gy)
            gt_box = np.array([[0.0, 0.0, gw, gh]], np.float32)
            anch_ious = _bbox_iou_corners_np(gt_box, anchor_shapes)
            best_n = int(np.argmax(anch_ious))
            if best_n not in anchor_index:
                continue
            cbn = best_n - anchor_index[0]
            if 0 <= gj < in_h and 0 <= gi < in_w:
                obj_mask[b, cbn, gj, gi] = 1.0
                coodn_mask[b, cbn, gj, gi] = 1.0
                tx[b, cbn, gj, gi] = gx - gi
                ty[b, cbn, gj, gi] = gy - gj
                tw[b, cbn, gj, gi] = np.log(gw / anchor_shapes[best_n, 2] + 1e-16)
                th[b, cbn, gj, gi] = np.log(gh / anchor_shapes[best_n, 3] + 1e-16)
                bls_x[b, cbn, gj, gi] = tb[t, 2]
                bls_y[b, cbn, gj, gi] = tb[t, 3]
                tconf[b, cbn, gj, gi] = 1.0
                tcls[b, cbn, gj, gi, int(tb[t, 4])] = 1.0

    t_box = np.stack([tx, ty, tw, th], axis=-1)
    return obj_mask, coodn_mask, t_box, tconf, tcls, bls_x, bls_y


def pack_target_slab_np(obj_mask, coodn_mask, t_box, tcls, bls_x, bls_y,
                        ba_pad, hw_pad):
    """Pack all targets into one (BA_pad, TROWS, HW_pad) f32 slab (host-side, cheap).

    tconf is intentionally NOT packed: it equals coodn_mask by construction.
    Padding rows/lanes are zero, so (mask-multiplied) loss contributions are 0.
    """
    bs, A, in_h, in_w = obj_mask.shape
    BA, HW = bs * A, in_h * in_w
    slab = np.zeros((ba_pad, TROWS, hw_pad), np.float32)
    # tbox: (bs,A,H,W,4) -> (BA, 4, HW)
    slab[:BA, TBOX_R:TBOX_R + 4, :HW] = \
        t_box.transpose(0, 1, 4, 2, 3).reshape(BA, 4, HW)
    # tcls: (bs,A,H,W,C) -> (BA, C, HW)
    slab[:BA, TCLS_R:TCLS_R + NUM_CLASSES, :HW] = \
        tcls.transpose(0, 1, 4, 2, 3).reshape(BA, NUM_CLASSES, HW)
    slab[:BA, OBJ_R, :HW] = obj_mask.reshape(BA, HW)
    slab[:BA, COOD_R, :HW] = coodn_mask.reshape(BA, HW)
    slab[:BA, BLS_R, :HW] = (2.0 - bls_x * bls_y).reshape(BA, HW)
    return slab


# ------------------------------- Pallas kernel -------------------------------
def _bce(p, t):
    logp = jnp.maximum(jnp.log(p), BCE_LOG_CLAMP)
    log1mp = jnp.maximum(jnp.log(1.0 - p), BCE_LOG_CLAMP)
    return -(t * logp + (1.0 - t) * log1mp)


def yolo_loss_kernel(pred_ref, tgt_ref, out_ref):
    """One grid step: per-tile partial sums of (conf, cls, loc) losses.

    pred_ref: (TB, ATTRS, T_HW) raw network outputs (native layout, no transpose)
    tgt_ref : (TB, TROWS, T_HW) packed targets/masks
    out_ref : (1, 1, 8, 128) lane-dense partial-sum tile
              row 0 = loss_conf, row 1 = loss_cls, row 2 = loss_loc (broadcast
              across lanes); combined by XLA outside the kernel.
    """
    pred = pred_ref[...]
    tgt = tgt_ref[...]

    px = jax.nn.sigmoid(pred[:, 0:1, :])
    py = jax.nn.sigmoid(pred[:, 1:2, :])
    pw = pred[:, 2:3, :]
    ph = pred[:, 3:4, :]
    pconf = jax.nn.sigmoid(pred[:, 4:5, :])
    pcls = jax.nn.sigmoid(pred[:, 5:, :])                 # (TB, C, T_HW)

    tx = tgt[:, TBOX_R + 0:TBOX_R + 1, :]
    ty = tgt[:, TBOX_R + 1:TBOX_R + 2, :]
    tw = tgt[:, TBOX_R + 2:TBOX_R + 3, :]
    th = tgt[:, TBOX_R + 3:TBOX_R + 4, :]
    tcls = tgt[:, TCLS_R:TCLS_R + NUM_CLASSES, :]
    obj = tgt[:, OBJ_R:OBJ_R + 1, :]
    cood = tgt[:, COOD_R:COOD_R + 1, :]
    bls = tgt[:, BLS_R:BLS_R + 1, :]

    # localisation: masked, box-scale weighted MSE (reduction='sum')
    loc = cood * ((px * bls - tx * bls) ** 2
                  + (py * bls - ty * bls) ** 2
                  + (pw * bls - tw * bls) ** 2
                  + (ph * bls - th * bls) ** 2)
    # objectness BCE over obj_mask (tconf == coodn_mask by construction),
    # class BCE over coodn_mask (reduction='sum')
    conf = obj * _bce(pconf, cood)
    cls = cood * _bce(pcls, tcls)

    loss_conf = jnp.sum(conf)
    loss_cls = jnp.sum(cls)
    loss_loc = jnp.sum(loc)

    row = lax.broadcasted_iota(jnp.int32, (8, 128), 0)
    tile = (jnp.where(row == 0, loss_conf, 0.0)
            + jnp.where(row == 1, loss_cls, 0.0)
            + jnp.where(row == 2, loss_loc, 0.0))
    out_ref[0, 0] = tile


def _choose_tiles(ba, hw):
    """Pick (BA_pad, HW_pad, TB, T_HW). Each step should move >= ~1-2 MB so the
    kernel is HBM-bound rather than grid-overhead-bound; small problems collapse
    to a single grid step."""
    lane = 128
    hw_pad = -(-hw // lane) * lane
    max_lanes = 16384                       # per-step lane-tile cap
    if hw_pad <= max_lanes:
        t_hw = hw_pad
    else:
        t_hw = max_lanes
        hw_pad = -(-hw_pad // t_hw) * t_hw
    target_cells = 32768                    # * 72 B/cell ~= 2.4 MB per step
    tb = max(1, min(ba, target_cells // t_hw))
    ba_pad = -(-ba // tb) * tb
    return ba_pad, hw_pad, tb, t_hw


def yolo_tiny_loss(inp, targets):
    """Forward pass of YOLOTinyLoss (iou_loss_mode='l2').

    Returns (loss, loss_conf, loss_cls, loss_loc) as JAX scalars (no forced
    host syncs inside the wrapper)."""
    bs, _, in_h, in_w = inp.shape
    A = len(ANCHORS) // 2
    BA, HW = bs * A, in_h * in_w

    # One D2H copy of the raw NCHW tensor; all host reshapes/permutes are cheap
    # numpy views (no device-side transpose feeding np.asarray).
    inp_np = np.asarray(inp, dtype=np.float32)
    pred_np = inp_np.reshape(bs, A, ATTRS, in_h, in_w).transpose(0, 1, 3, 4, 2)
    targets_np = np.asarray(targets, dtype=np.float32)

    (obj_mask, coodn_mask, t_box, _tconf, tcls,
     bls_x, bls_y) = build_target_np(pred_np, targets_np, ANCHORS, NUM_CLASSES,
                                     IMG_SIZE, in_w, in_h, IGNORE_THRESHOLD)

    ba_pad, hw_pad, tb, t_hw = _choose_tiles(BA, HW)
    g0, g1 = ba_pad // tb, hw_pad // t_hw

    # pred in native layout: (bs, A*ATTRS, H, W) -> (BA, ATTRS, HW) is a free
    # reshape (identical row-major flattening); zero-pad only if needed.
    pred_dev = inp.reshape(BA, ATTRS, HW).astype(jnp.float32)
    if (ba_pad, hw_pad) != (BA, HW):
        pred_dev = jnp.pad(pred_dev,
                           ((0, ba_pad - BA), (0, 0), (0, hw_pad - HW)))

    tgt_slab = jnp.asarray(
        pack_target_slab_np(obj_mask, coodn_mask, t_box, tcls, bls_x, bls_y,
                            ba_pad, hw_pad))

    out = pl.pallas_call(
        yolo_loss_kernel,
        out_shape=jax.ShapeDtypeStruct((g0, g1, 8, 128), jnp.float32),
        grid_spec=pltpu.PrefetchScalarGridSpec(
            num_scalar_prefetch=0,
            grid=(g0, g1),
            in_specs=[
                pl.BlockSpec((tb, ATTRS, t_hw), lambda i, j: (i, 0, j)),
                pl.BlockSpec((tb, TROWS, t_hw), lambda i, j: (i, 0, j)),
            ],
            out_specs=pl.BlockSpec((1, 1, 8, 128), lambda i, j: (i, j, 0, 0)),
        ),
        compiler_params=pltpu.CompilerParams(
            dimension_semantics=("parallel", "parallel")),
    )(pred_dev, tgt_slab)

    # tiny final combine in XLA: lane 0 of rows 0..2, summed over all grid steps
    sums = jnp.sum(out[:, :, :, 0], axis=(0, 1))       # (8,)
    loss_conf, loss_cls, loss_loc = sums[0], sums[1], sums[2]
    loss = (LAMBDA_CONF * loss_conf + LAMBDA_CLS * loss_cls
            + LAMBDA_LOC * loss_loc)
    return loss, loss_conf, loss_cls, loss_loc


# ------------------------------ numpy reference ------------------------------
def reference_loss_np(pred_np, obj_mask, coodn_mask, t_box, tconf, tcls, bls):
    p = pred_np.astype(np.float64)
    x = _sigmoid_np(p[..., 0]); y = _sigmoid_np(p[..., 1])
    w = p[..., 2]; h = p[..., 3]
    conf = _sigmoid_np(p[..., 4]); cls = _sigmoid_np(p[..., 5:])
    m = coodn_mask.astype(np.float64)
    bls = bls.astype(np.float64)

    def bce(pp, tt):
        return -(tt * np.maximum(np.log(pp), BCE_LOG_CLAMP)
                 + (1.0 - tt) * np.maximum(np.log(1.0 - pp), BCE_LOG_CLAMP))

    lloc = (np.sum(m * (x * bls - t_box[..., 0] * bls) ** 2)
            + np.sum(m * (y * bls - t_box[..., 1] * bls) ** 2)
            + np.sum(m * (w * bls - t_box[..., 2] * bls) ** 2)
            + np.sum(m * (h * bls - t_box[..., 3] * bls) ** 2))
    lconf = np.sum(obj_mask * bce(conf, tconf))
    lcls = np.sum(m[..., None] * bce(cls, tcls))
    total = LAMBDA_CONF * lconf + LAMBDA_CLS * lcls + LAMBDA_LOC * lloc
    return total, lconf, lcls, lloc


# ----------------------------------- main ------------------------------------
if __name__ == "__main__":
    bs, in_h, in_w = 2, 16, 16           # in_w == img_size//16 -> anchors [3,4,5]
    A = len(ANCHORS) // 2
    T = 4                                # padded targets per image

    key = jax.random.PRNGKey(0)
    kx, kt1, kt2, kt3 = jax.random.split(key, 4)
    x_inp = 0.5 * jax.random.normal(kx, (bs, A * ATTRS, in_h, in_w), jnp.float32)

    t_xy = jax.random.uniform(kt1, (bs, T, 2), minval=0.05, maxval=0.95)
    t_wh = jax.random.uniform(kt2, (bs, T, 2), minval=0.10, maxval=0.45)
    t_cl = jax.random.randint(kt3, (bs, T, 1), 0, NUM_CLASSES).astype(jnp.float32)
    targets = jnp.concatenate([t_xy, t_wh, t_cl], axis=-1)
    targets = targets.at[:, -1, 4].set(-1.0)  # last row per image = padding

    loss, loss_conf, loss_cls, loss_loc = yolo_tiny_loss(x_inp, targets)
    loss = jax.block_until_ready(loss)

    # sanity check against a pure-numpy reference of the same forward pass
    pred_np = np.asarray(x_inp, np.float32).reshape(
        bs, A, ATTRS, in_h, in_w).transpose(0, 1, 3, 4, 2)
    tgt_np = np.asarray(targets, np.float32)
    (obj_m, cood_m, t_box, tconf_t, tcls_t,
     bx, by) = build_target_np(pred_np, tgt_np, ANCHORS, NUM_CLASSES,
                               IMG_SIZE, in_w, in_h, IGNORE_THRESHOLD)
    ref_total, ref_conf, ref_cls, ref_loc = reference_loss_np(
        pred_np, obj_m, cood_m, t_box, tconf_t, tcls_t, 2.0 - bx * by)

    np.testing.assert_allclose(float(loss), ref_total, rtol=1e-3, atol=1e-3)
    np.testing.assert_allclose(float(loss_conf), ref_conf, rtol=1e-3, atol=1e-3)
    np.testing.assert_allclose(float(loss_cls), ref_cls, rtol=1e-3, atol=1e-3)
    np.testing.assert_allclose(float(loss_loc), ref_loc, rtol=1e-3, atol=1e-3)

    print("KERNEL_OK")
</pallas_src>

<mosaic_0001>
module attributes {stable_mosaic.version = 11 : i64} {
  func.func @yolo_loss_kernel(%arg0: i32, %arg1: i32, %arg2: memref<6x8x256xf32, #tpu.memory_space<vmem>>, %arg3: memref<6x10x256xf32, #tpu.memory_space<vmem>>, %arg4: memref<1x1x8x128xf32, #tpu.memory_space<vmem>>) attributes {dimension_semantics = [#tpu.dimension_semantics<parallel>, #tpu.dimension_semantics<parallel>], iteration_bounds = array<i64: 1, 1>, scalar_prefetch = 0 : i64, scratch_operands = 0 : i64, tpu.core_type = #tpu.core_type<tc>, window_params = [{transform_indices = @transform_0, window_bounds = array<i64: 6, 8, 256>}, {transform_indices = @transform_1, window_bounds = array<i64: 6, 10, 256>}, {transform_indices = @transform_2, window_bounds = array<i64: 1, 1, 8, 128>}]} {
    %c0 = arith.constant 0 : index
    %c0_0 = arith.constant 0 : index
    %c0_1 = arith.constant 0 : index
    %0 = vector.load %arg2[%c0, %c0_0, %c0_1] : memref<6x8x256xf32, #tpu.memory_space<vmem>>, vector<6x8x256xf32>
    %c0_2 = arith.constant 0 : index
    %c0_3 = arith.constant 0 : index
    %c0_4 = arith.constant 0 : index
    %1 = vector.load %arg3[%c0_2, %c0_3, %c0_4] : memref<6x10x256xf32, #tpu.memory_space<vmem>>, vector<6x10x256xf32>
    %2 = vector.extract_strided_slice %0 {offsets = [0, 0, 0], sizes = [6, 1, 256], strides = [1, 1, 1]} : vector<6x8x256xf32> to vector<6x1x256xf32>
    %3 = arith.negf %2 : vector<6x1x256xf32>
    %4 = math.exp %3 : vector<6x1x256xf32>
    %cst = arith.constant 1.000000e+00 : f32
    %5 = vector.broadcast %cst : f32 to vector<6x1x256xf32>
    %6 = arith.addf %5, %4 : vector<6x1x256xf32>
    %7 = arith.divf %5, %6 : vector<6x1x256xf32>
    %8 = vector.extract_strided_slice %0 {offsets = [0, 1, 0], sizes = [6, 1, 256], strides = [1, 1, 1]} : vector<6x8x256xf32> to vector<6x1x256xf32>
    %9 = arith.negf %8 : vector<6x1x256xf32>
    %10 = math.exp %9 : vector<6x1x256xf32>
    %cst_5 = arith.constant 1.000000e+00 : f32
    %11 = vector.broadcast %cst_5 : f32 to vector<6x1x256xf32>
    %12 = arith.addf %11, %10 : vector<6x1x256xf32>
    %13 = arith.divf %11, %12 : vector<6x1x256xf32>
    %14 = vector.extract_strided_slice %0 {offsets = [0, 2, 0], sizes = [6, 1, 256], strides = [1, 1, 1]} : vector<6x8x256xf32> to vector<6x1x256xf32>
    %15 = vector.extract_strided_slice %0 {offsets = [0, 3, 0], sizes = [6, 1, 256], strides = [1, 1, 1]} : vector<6x8x256xf32> to vector<6x1x256xf32>
    %16 = vector.extract_strided_slice %0 {offsets = [0, 4, 0], sizes = [6, 1, 256], strides = [1, 1, 1]} : vector<6x8x256xf32> to vector<6x1x256xf32>
    %17 = arith.negf %16 : vector<6x1x256xf32>
    %18 = math.exp %17 : vector<6x1x256xf32>
    %cst_6 = arith.constant 1.000000e+00 : f32
    %19 = vector.broadcast %cst_6 : f32 to vector<6x1x256xf32>
    %20 = arith.addf %19, %18 : vector<6x1x256xf32>
    %21 = arith.divf %19, %20 : vector<6x1x256xf32>
    %22 = vector.extract_strided_slice %0 {offsets = [0, 5, 0], sizes = [6, 3, 256], strides = [1, 1, 1]} : vector<6x8x256xf32> to vector<6x3x256xf32>
    %23 = arith.negf %22 : vector<6x3x256xf32>
    %24 = math.exp %23 : vector<6x3x256xf32>
    %cst_7 = arith.constant 1.000000e+00 : f32
    %25 = vector.broadcast %cst_7 : f32 to vector<6x3x256xf32>
    %26 = arith.addf %25, %24 : vector<6x3x256xf32>
    %27 = arith.divf %25, %26 : vector<6x3x256xf32>
    %28 = vector.extract_strided_slice %1 {offsets = [0, 0, 0], sizes = [6, 1, 256], strides = [1, 1, 1]} : vector<6x10x256xf32> to vector<6x1x256xf32>
    %29 = vector.extract_strided_slice %1 {offsets = [0, 1, 0], sizes = [6, 1, 256], strides = [1, 1, 1]} : vector<6x10x256xf32> to vector<6x1x256xf32>
    %30 = vector.extract_strided_slice %1 {offsets = [0, 2, 0], sizes = [6, 1, 256], strides = [1, 1, 1]} : vector<6x10x256xf32> to vector<6x1x256xf32>
    %31 = vector.extract_strided_slice %1 {offsets = [0, 3, 0], sizes = [6, 1, 256], strides = [1, 1, 1]} : vector<6x10x256xf32> to vector<6x1x256xf32>
    %32 = vector.extract_strided_slice %1 {offsets = [0, 4, 0], sizes = [6, 3, 256], strides = [1, 1, 1]} : vector<6x10x256xf32> to vector<6x3x256xf32>
    %33 = vector.extract_strided_slice %1 {offsets = [0, 7, 0], sizes = [6, 1, 256], strides = [1, 1, 1]} : vector<6x10x256xf32> to vector<6x1x256xf32>
    %34 = vector.extract_strided_slice %1 {offsets = [0, 8, 0], sizes = [6, 1, 256], strides = [1, 1, 1]} : vector<6x10x256xf32> to vector<6x1x256xf32>
    %35 = vector.extract_strided_slice %1 {offsets = [0, 9, 0], sizes = [6, 1, 256], strides = [1, 1, 1]} : vector<6x10x256xf32> to vector<6x1x256xf32>
    %36 = arith.mulf %7, %35 : vector<6x1x256xf32>
    %37 = arith.mulf %28, %35 : vector<6x1x256xf32>
    %38 = arith.subf %36, %37 : vector<6x1x256xf32>
    %39 = arith.mulf %38, %38 : vector<6x1x256xf32>
    %40 = arith.mulf %13, %35 : vector<6x1x256xf32>
    %41 = arith.mulf %29, %35 : vector<6x1x256xf32>
    %42 = arith.subf %40, %41 : vector<6x1x256xf32>
    %43 = arith.mulf %42, %42 : vector<6x1x256xf32>
    %44 = arith.addf %39, %43 : vector<6x1x256xf32>
    %45 = arith.mulf %14, %35 : vector<6x1x256xf32>
    %46 = arith.mulf %30, %35 : vector<6x1x256xf32>
    %47 = arith.subf %45, %46 : vector<6x1x256xf32>
    %48 = arith.mulf %47, %47 : vector<6x1x256xf32>
    %49 = arith.addf %44, %48 : vector<6x1x256xf32>
    %50 = arith.mulf %15, %35 : vector<6x1x256xf32>
    %51 = arith.mulf %31, %35 : vector<6x1x256xf32>
    %52 = arith.subf %50, %51 : vector<6x1x256xf32>
    %53 = arith.mulf %52, %52 : vector<6x1x256xf32>
    %54 = arith.addf %49, %53 : vector<6x1x256xf32>
    %55 = arith.mulf %34, %54 : vector<6x1x256xf32>
    %56 = math.log %21 : vector<6x1x256xf32>
    %cst_8 = arith.constant -1.000000e+02 : f32
    %57 = vector.broadcast %cst_8 : f32 to vector<6x1x256xf32>
    %58 = arith.maximumf %56, %57 : vector<6x1x256xf32>
    %cst_9 = arith.constant 1.000000e+00 : f32
    %59 = vector.broadcast %cst_9 : f32 to vector<6x1x256xf32>
    %60 = arith.subf %59, %21 : vector<6x1x256xf32>
    %61 = math.log %60 : vector<6x1x256xf32>
    %cst_10 = arith.constant -1.000000e+02 : f32
    %62 = vector.broadcast %cst_10 : f32 to vector<6x1x256xf32>
    %63 = arith.maximumf %61, %62 : vector<6x1x256xf32>
    %64 = arith.mulf %34, %58 : vector<6x1x256xf32>
    %cst_11 = arith.constant 1.000000e+00 : f32
    %65 = vector.broadcast %cst_11 : f32 to vector<6x1x256xf32>
    %66 = arith.subf %65, %34 : vector<6x1x256xf32>
    %67 = arith.mulf %66, %63 : vector<6x1x256xf32>
    %68 = arith.addf %64, %67 : vector<6x1x256xf32>
    %cst_12 = arith.constant 0.000000e+00 : f32
    %69 = vector.broadcast %cst_12 : f32 to vector<6x1x256xf32>
    %70 = arith.subf %69, %68 : vector<6x1x256xf32>
    %71 = arith.mulf %33, %70 : vector<6x1x256xf32>
    %72 = math.log %27 : vector<6x3x256xf32>
    %cst_13 = arith.constant -1.000000e+02 : f32
    %73 = vector.broadcast %cst_13 : f32 to vector<6x3x256xf32>
    %74 = arith.maximumf %72, %73 : vector<6x3x256xf32>
    %cst_14 = arith.constant 1.000000e+00 : f32
    %75 = vector.broadcast %cst_14 : f32 to vector<6x3x256xf32>
    %76 = arith.subf %75, %27 : vector<6x3x256xf32>
    %77 = math.log %76 : vector<6x3x256xf32>
    %cst_15 = arith.constant -1.000000e+02 : f32
    %78 = vector.broadcast %cst_15 : f32 to vector<6x3x256xf32>
    %79 = arith.maximumf %77, %78 : vector<6x3x256xf32>
    %80 = arith.mulf %32, %74 : vector<6x3x256xf32>
    %cst_16 = arith.constant 1.000000e+00 : f32
    %81 = vector.broadcast %cst_16 : f32 to vector<6x3x256xf32>
    %82 = arith.subf %81, %32 : vector<6x3x256xf32>
    %83 = arith.mulf %82, %79 : vector<6x3x256xf32>
    %84 = arith.addf %80, %83 : vector<6x3x256xf32>
    %cst_17 = arith.constant 0.000000e+00 : f32
    %85 = vector.broadcast %cst_17 : f32 to vector<6x3x256xf32>
    %86 = arith.subf %85, %84 : vector<6x3x256xf32>
    %87 = vector.broadcast %34 : vector<6x1x256xf32> to vector<6x3x256xf32>
    %88 = arith.mulf %87, %86 : vector<6x3x256xf32>
    %89 = vector.shape_cast %71 : vector<6x1x256xf32> to vector<1x6x1x256xf32>
    %cst_18 = arith.constant dense<0.000000e+00> : vector<1xf32>
    %90 = vector.multi_reduction <add>, %89, %cst_18 [1, 2, 3] : vector<1x6x1x256xf32> to vector<1xf32>
    %91 = vector.shape_cast %90 : vector<1xf32> to vector<1x1x1x1xf32>
    %92 = vector.extract %91[0, 0, 0, 0] : f32 from vector<1x1x1x1xf32>
    %93 = vector.shape_cast %88 : vector<6x3x256xf32> to vector<1x6x3x256xf32>
    %cst_19 = arith.constant dense<0.000000e+00> : vector<1xf32>
    %94 = vector.multi_reduction <add>, %93, %cst_19 [1, 2, 3] : vector<1x6x3x256xf32> to vector<1xf32>
    %95 = vector.shape_cast %94 : vector<1xf32> to vector<1x1x1x1xf32>
    %96 = vector.extract %95[0, 0, 0, 0] : f32 from vector<1x1x1x1xf32>
    %97 = vector.shape_cast %55 : vector<6x1x256xf32> to vector<1x6x1x256xf32>
    %cst_20 = arith.constant dense<0.000000e+00> : vector<1xf32>
    %98 = vector.multi_reduction <add>, %97, %cst_20 [1, 2, 3] : vector<1x6x1x256xf32> to vector<1xf32>
    %99 = vector.shape_cast %98 : vector<1xf32> to vector<1x1x1x1xf32>
    %100 = vector.extract %99[0, 0, 0, 0] : f32 from vector<1x1x1x1xf32>
    %101 = tpu.iota {dimensions = array<i32: 0>} : vector<8x128xi32>
    %c0_i32 = arith.constant 0 : i32
    %102 = vector.broadcast %c0_i32 : i32 to vector<8x128xi32>
    %103 = arith.cmpi eq, %101, %102 : vector<8x128xi32>
    %cst_21 = arith.constant 0.000000e+00 : f32
    %104 = vector.broadcast %92 : f32 to vector<8x128xf32>
    %105 = vector.broadcast %cst_21 : f32 to vector<8x128xf32>
    %106 = arith.select %103, %104, %105 : vector<8x128xi1>, vector<8x128xf32>
    %c1_i32 = arith.constant 1 : i32
    %107 = vector.broadcast %c1_i32 : i32 to vector<8x128xi32>
    %108 = arith.cmpi eq, %101, %107 : vector<8x128xi32>
    %cst_22 = arith.constant 0.000000e+00 : f32
    %109 = vector.broadcast %96 : f32 to vector<8x128xf32>
    %110 = vector.broadcast %cst_22 : f32 to vector<8x128xf32>
    %111 = arith.select %108, %109, %110 : vector<8x128xi1>, vector<8x128xf32>
    %112 = arith.addf %106, %111 : vector<8x128xf32>
    %c2_i32 = arith.constant 2 : i32
    %113 = vector.broadcast %c2_i32 : i32 to vector<8x128xi32>
    %114 = arith.cmpi eq, %101, %113 : vector<8x128xi32>
    %cst_23 = arith.constant 0.000000e+00 : f32
    %115 = vector.broadcast %100 : f32 to vector<8x128xf32>
    %116 = vector.broadcast %cst_23 : f32 to vector<8x128xf32>
    %117 = arith.select %114, %115, %116 : vector<8x128xi1>, vector<8x128xf32>
    %118 = arith.addf %112, %117 : vector<8x128xf32>
    %c0_24 = arith.constant 0 : index
    %c0_25 = arith.constant 0 : index
    %c0_26 = arith.constant 0 : index
    %c0_27 = arith.constant 0 : index
    %119 = vector.load %arg4[%c0_24, %c0_25, %c0_26, %c0_27] : memref<1x1x8x128xf32, #tpu.memory_space<vmem>>, vector<1x1x8x128xf32>
    %120 = vector.shape_cast %119 : vector<1x1x8x128xf32> to vector<8x128xf32>
    %121 = vector.shape_cast %118 : vector<8x128xf32> to vector<1x1x8x128xf32>
    tpu.vector_store %arg4[%c0_24, %c0_25, %c0_26, %c0_27], %121 {strides = array<i32>} : memref<1x1x8x128xf32, #tpu.memory_space<vmem>>, vector<1x1x8x128xf32>,
    return
  }
  func.func @transform_0(%arg0: i32, %arg1: i32) -> (i32, i32, i32) {
    %c0_i32 = arith.constant 0 : i32
    %c0_i32_0 = arith.constant 0 : i32
    return %arg0, %c0_i32, %arg1 : i32, i32, i32
  }
  func.func @transform_1(%arg0: i32, %arg1: i32) -> (i32, i32, i32) {
    %c0_i32 = arith.constant 0 : i32
    %c0_i32_0 = arith.constant 0 : i32
    return %arg0, %c0_i32, %arg1 : i32, i32, i32
  }
  func.func @transform_2(%arg0: i32, %arg1: i32) -> (i32, i32, i32, i32) {
    %c0_i32 = arith.constant 0 : i32
    %c0_i32_0 = arith.constant 0 : i32
    %c0_i32_1 = arith.constant 0 : i32
    return %arg0, %arg1, %c0_i32, %c0_i32_0 : i32, i32, i32, i32
  }
}

</mosaic_0001>

<bundles_post_ra>
// kernel: tpu_custom_call.1
= control target key start
LH: loop header
LB: loop body
LE: loop exit
PB: predicated region body
PF: predicated region fallthrough
CT: control target
= control target key end

     0   :  { %s2562_s0 = inlined_call_operand.vmem [shape: f32[6,8,256], index: 0, kind: input, shape index: {}]   ;;  %s2563_s1 = inlined_call_operand.vmem [shape: f32[6,10,256], index: 1, kind: input, shape index: {}]   ;;  %s2564_s2 = inlined_call_operand.hbm [shape: f32[1,1,8,128], index: 2, kind: output, shape index: {}]  }
   0x1   :  { %v1376_v0 = vld [vmem:[%s2562_s0] sm:$0xff]  ;;  %v1381_v1 = vld [vmem:[%s2562_s0 + $0x8] sm:$0xff]  ;;  %v1386_v2 = vld [vmem:[%s2562_s0 + $0x10] sm:$0xff] }
   0x2   :  { %2662 = vst [vmem:[#allocation5_spill] sm:$0xff] %v1376_v0  ;;  %2663 = vst [vmem:[#allocation6_spill] sm:$0xff] %v1381_v1  ;;  %v1391_v3 = vld [vmem:[%s2562_s0 + $0x18] sm:$0xff]  ;;  %v1182_v4 = vmul.f32 -1.442695, %v1376_v0  ;;  %v1397_v5 = vld [vmem:[%s2562_s0 + $0x20] sm:$0xff] }
   0x3   :  { %2664 = vst [vmem:[#allocation7_spill] sm:$0xff] %v1386_v2  ;;  %2665 = vst [vmem:[#allocation8_spill] sm:$0xff] %v1391_v3  ;;  %v1183_v6 = vmul.f32 -1.442695, %v1381_v1  ;;  %v1184_v7 = vmul.f32 -1.442695, %v1386_v2 }
   0x4   :  { %2666 = vst [vmem:[#allocation9_spill] sm:$0xff] %v1397_v5  ;;  %1201 = vpow2.f32 %v1182_v4  ;;  %v1185_v8 = vmul.f32 -1.442695, %v1391_v3  ;;  %v1405_v9 = vld [vmem:[%s2562_s0 + $0x28] sm:$0xff]  ;;  %v1186_v10 = vmul.f32 -1.442695, %v1397_v5 }
   0x5   :  { %1203 = vpow2.f32 %v1183_v6  ;;  %2667 = vst [vmem:[#allocation10_spill] sm:$0xff] %v1405_v9  ;;  %v1411_v11 = vld [vmem:[%s2562_s0 + $0x30] sm:$0xff]  ;;  %v1416_v12 = vld [vmem:[%s2562_s0 + $0x38] sm:$0xff]  ;;  %v1421_v13 = vld [vmem:[%s2562_s0 + $0x40] sm:$0xff]  ;;  %v1187_v16 = vmul.f32 -1.442695, %v1405_v9 }
   0x6   :  { %1205 = vpow2.f32 %v1184_v7  ;;  %2668 = vst [vmem:[#allocation11_spill] sm:$0xff] %v1411_v11  ;;  %2669 = vst [vmem:[#allocation12_spill] sm:$0xff] %v1416_v12  ;;  %v1426_v14 = vld [vmem:[%s2562_s0 + $0x48] sm:$0xff]  ;;  %v1431_v15 = vld [vmem:[%s2562_s0 + $0x50] sm:$0xff]  ;;  %v1188_v20 = vmul.f32 -1.442695, %v1411_v11 }
   0x7   :  { %1207 = vpow2.f32 %v1185_v8  ;;  %2670 = vst [vmem:[#allocation13_spill] sm:$0xff] %v1421_v13  ;;  %2671 = vst [vmem:[#allocation14_spill] sm:$0xff] %v1426_v14  ;;  %v1437_v17 = vld [vmem:[%s2562_s0 + $0x58] sm:$0xff]  ;;  %v1442_v18 = vld [vmem:[%s2563_s1] sm:$0xff]  ;;  %v1189_v30 = vmul.f32 -1.442695, %v1416_v12 }
   0x8   :  { %1209 = vpow2.f32 %v1186_v10  ;;  %2672 = vst [vmem:[#allocation15_spill] sm:$0xff] %v1431_v15  ;;  %2673 = vst [vmem:[#allocation16_spill] sm:$0xff] %v1437_v17  ;;  %v1447_v19 = vld [vmem:[%s2563_s1 + $0x10] sm:$0x3]  ;;  %v1453_v21 = vld [vmem:[%s2563_s1 + $0x8] sm:$0xff] }
   0x9   :  { %2674 = vst [vmem:[#allocation17_spill] sm:$0xff] %v1447_v19  ;;  %v1458_v22 = vld [vmem:[%s2563_s1 + $0x18] sm:$0x3]  ;;  %v1463_v23 = vld [vmem:[%s2563_s1 + $0x20] sm:$0xff]  ;;  %v1468_v24 = vld [vmem:[%s2563_s1 + $0x30] sm:$0x3]  ;;  %1211 = vpow2.f32 %v1187_v16  ;;  %v1518_v41 = vmul.f32 %v1447_v19, %v1442_v18 }
   0xa   :  { %2675 = vst [vmem:[#allocation18_spill] sm:$0xff] %v1458_v22  ;;  %v1473_v25 = vld [vmem:[%s2563_s1 + $0x28] sm:$0xff]  ;;  %v1478_v26 = vld [vmem:[%s2563_s1 + $0x38] sm:$0x3]  ;;  %v1483_v27 = vld [vmem:[%s2563_s1 + $0x40] sm:$0xff]  ;;  %1213 = vpow2.f32 %v1188_v20 }
   0xb   :  { %v1488_v28 = vld [vmem:[%s2563_s1 + $0x50] sm:$0x3]  ;;  %v1190_v31 = vmul.f32 -1.442695, %v1421_v13  ;;  %v1191_v32 = vmul.f32 -1.442695, %v1426_v14  ;;  %1215 = vpow2.f32 %v1189_v30 }
   0xc   :  { %v1497_v34 = vld [vmem:[%s2563_s1 + $0x48] sm:$0xff]  ;;  %v1502_v35 = vld [vmem:[%s2563_s1 + $0x58] sm:$0x3]  ;;  %v1507_v36 = vld [vmem:[%s2563_s1 + $0x60] sm:$0xff]  ;;  %v1192_v37 = vmul.f32 -1.442695, %v1431_v15 }
   0xd   :  { %2676 = vst [vmem:[#allocation19_spill] sm:$0xff] %v1497_v34  ;;  %2677 = vst [vmem:[#allocation20_spill] sm:$0xff] %v1502_v35  ;;  %v1513_v39 = vld [vmem:[%s2563_s1 + $0x70] sm:$0x3]  ;;  %v1193_v40 = vmul.f32 -1.442695, %v1437_v17 }
   0xe   :  { %v1202_v33 = vpop.eup %1201  ;;  %2678 = vst [vmem:[#allocation21_spill] sm:$0xff] %v1507_v36  ;;  %2679 = vst [vmem:[#allocation22_spill] sm:$0xff] %v1513_v39 }
   0xf   :  { %v1204_v38 = vpop.eup %1203  ;;  %2680 = vst [vmem:[#allocation23_spill] sm:$0xff] %v1518_v41 }
  0x10   :  { %7 = vsyncpa [#allocation3], 0  ;;  %v1206_v42 = vpop.eup %1205  ;;  %v1523_v43 = vld [vmem:[%s2563_s1 + $0x68] sm:$0xff]  ;;  %v1528_v44 = vld [vmem:[%s2563_s1 + $0x78] sm:$0x3]  ;;  %1217 = vpow2.f32 %v1190_v31  ;;  %v1538_v47 = vmul.f32 %v1458_v22, %v1453_v21  ;;  %v1542_v48 = vmul.f32 %v1468_v24, %v1463_v23  ;;  %v84_v53 = vadd.f32 1.0, %v1202_v33 }
  0x11   :  { %2681 = vst [vmem:[#allocation24_spill] sm:$0xff] %v1523_v43  ;;  %v1533_v45 = vld [vmem:[%s2563_s1 + $0x80] sm:$0xff]  ;;  %v1208_v49 = vpop.eup %1207  ;;  %v1547_v50 = vld [vmem:[%s2563_s1 + $0x88] sm:$0xff]  ;;  %v1552_v51 = vld [vmem:[%s2563_s1 + $0x90] sm:$0x3]  ;;  %1219 = vpow2.f32 %v1191_v32  ;;  %v1561_v54 = vmul.f32 %v1478_v26, %v1473_v25  ;;  %v1565_v55 = vmul.f32 %v1488_v28, %v1483_v27  ;;  %v85_v59 = vadd.f32 1.0, %v1204_v38 }
  0x12   :  { %2682 = vst [vmem:[#allocation25_spill] sm:$0xff] %v1533_v45  ;;  %2683 = vst [vmem:[#allocation26_spill] sm:$0xff] %v1538_v47  ;;  %v1557_v52 = vld [vmem:[%s2563_s1 + $0x98] sm:$0x3]  ;;  %v1210_v56 = vpop.eup %1209  ;;  %v1570_v57 = vld [vmem:[%s2563_s1 + $0xa0] sm:$0xff]  ;;  %1221 = vpow2.f32 %v1192_v37  ;;  %v1579_v60 = vmul.f32 %v1502_v35, %v1497_v34  ;;  %v1583_v61 = vmul.f32 %v1513_v39, %v1507_v36  ;;  %v86_v62 = vadd.f32 1.0, %v1206_v42 }
  0x13   :  { %2684 = vst [vmem:[#allocation27_spill] sm:$0xff] %v1542_v48  ;;  %2685 = vst [vmem:[#allocation28_spill] sm:$0xff] %v1547_v50  ;;  %v1575_v58 = vld [vmem:[%s2563_s1 + $0xb0] sm:$0x3]  ;;  %1223 = vpow2.f32 %v1193_v40  ;;  %v1588_v4 = vmul.f32 %v1528_v44, %v1523_v43  ;;  %v87_v6 = vadd.f32 1.0, %v1208_v49  ;;  %v1593_v8 = vmul.f32 %v1552_v51, %v1533_v45  ;;  %v1212_v16 = vpop.eup %1211  ;;  %s1357_s14 = smov [#allocation2]  }
  0x14   :  { %2686 = vst [vmem:[#allocation29_spill] sm:$0xff] %v1561_v54  ;;  %2687 = vst [vmem:[#allocation30_spill] sm:$0xff] %v1565_v55  ;;  %v1597_v10 = vmul.f32 %v1557_v52, %v1547_v50  ;;  %v88_v20 = vadd.f32 1.0, %v1210_v56  ;;  %1225 = vrcp.f32 %v84_v53  ;;  %v1602_v31 = vmul.f32 %v1575_v58, %v1570_v57  ;;  %v1214_v32 = vpop.eup %1213  ;;  %v1609_v40 = vld [vmem:[%s2563_s1 + $0xb8] sm:$0x3]  ;;  %s1174_s15 = sshll.u32 %s1357_s14, 4  ;;  %s1175_s15 = int_to_ptr.vmem [resolvable:$true] %s1174_s15 }
  0x15   :  { %2688 = vst [vmem:[#allocation31_spill] sm:$0xff] %v1570_v57  ;;  %2689 = vst [vmem:[#allocation32_spill] sm:$0xff] %v1579_v60  ;;  %v89_v33 = vadd.f32 1.0, %v1212_v16  ;;  %1227 = vrcp.f32 %v85_v59  ;;  %v90_v42 = vadd.f32 1.0, %v1214_v32  ;;  %v1216_v37 = vpop.eup %1215  ;;  %v132_v38 = vrot.slane %v1447_v19, 1  ;;  %s1333_s16 = scalar_lea.vmem %s1175_s15, 128  ;;  %p1338_p1 = scmp.lt.s32.totalorder %s1175_s15, %s1175_s15 }
  0x16   :  { %2690 = vst [vmem:[#allocation33_spill] sm:$0xff] %v1583_v61  ;;  %2691 = vst [vmem:[#allocation34_spill] sm:$0xff] %v1588_v4  ;;  %1229 = vrcp.f32 %v86_v62  ;;  %v133_v30 = vrot.slane %v1458_v22, 1  ;;  %v91_v7 = vadd.f32 1.0, %v1216_v37  ;;  %v135_v53 = vrot.slane %v1478_v26, 1  ;;  %p1334_p0 = scmp.ne.s32.totalorder %s1175_s15, %s1333_s16  ;;  %p1339_p2 = scmp.lt.s32.totalorder %s1333_s16, %s1333_s16 }
  0x17   :  { %2692 = vst [vmem:[#allocation35_spill] sm:$0xff] %v1593_v8  ;;  %2693 = vst [vmem:[#allocation36_spill] sm:$0xff] %v1597_v10  ;;  %1231 = vrcp.f32 %v87_v6  ;;  %v2698_v32 = vrot.slane %v1502_v35, 1  ;;  %v2707_v13 = vrot.slane %v1575_v58, 1  ;;  %vm1020_vm0 = vcmask 1040384  }
  0x18   :  { %2694 = vst [vmem:[#allocation37_spill] sm:$0xff] %v1602_v31  ;;  %1233 = vrcp.f32 %v88_v20  ;;  %v168_v20 = vmul.f32 %v132_v38, %v1442_v18  ;;  %vm1089_vm1 = vcmask 1042432   ;;  %p1340_p3 = por %p1339_p2, %p1338_p1 }
  0x19   :  { %1235 = vrcp.f32 %v89_v33  ;;  %v173_v29 = vmul.f32 %v2698_v32, %v1497_v34  ;;  %v2704_v32 = vrot.slane %v1557_v52, 1  ;;  %v1678_v12 = vmul.f32 %v2707_v13, %v1570_v57 }
  0x1a   :  { %v1218_v62 = vpop.eup %1217  ;;  %1237 = vrcp.f32 %v90_v42  ;;  %v2697_v42 = vrot.slane %v1488_v28, 1  ;;  %v2717_v13 = vrot.slane %v1488_v28, 1  ;;  %p1341_p4 = pnand %p1340_p3, %p1334_p0 }
  0x1b   :  { %v1220_v56 = vpop.eup %1219  ;;  %v92_v49 = vadd.f32 1.0, %v1218_v62  ;;  %1239 = vrcp.f32 %v91_v7  ;;  %v1634_v7 = vld [vmem:[%s2563_s1 + $0xa8] sm:$0xff]  ;;  %v1670_v14 = vmul.f32 %v2704_v32, %v1547_v50  ;;  %2708 = vst [vmem:[#allocation43_spill] sm:$0xff] %v1678_v12 }
  0x1c   :  { %v1222_v59 = vpop.eup %1221  ;;  %v93_v63 = vadd.f32 1.0, %v1220_v56  ;;  %2695 = vst [vmem:[#allocation38_spill] sm:$0xff] %v1634_v7  ;;  %v2696_v56 = vrot.slane %v1468_v24, 1  ;;  %v172_v6 = vmul.f32 %v2697_v42, %v1483_v27  ;;  %v2702_v42 = vrot.slane %v1552_v51, 1 }
  0x1d   :  { %v1224_v37 = vpop.eup %1223  ;;  %v94_v33 = vadd.f32 1.0, %v1222_v59  ;;  %1241 = vrcp.f32 %v92_v49  ;;  %v169_v49 = vmul.f32 %v133_v30, %v1453_v21  ;;  %2705 = vst [vmem:[#allocation41_spill] sm:$0xff] %v1670_v14 }
  0x1e   :  { %v95_v62 = vadd.f32 1.0, %v1224_v37  ;;  %1243 = vrcp.f32 %v93_v63  ;;  %v1629_v16 = vpop.eup %1225  ;;  %v170_v59 = vmul.f32 %v2696_v56, %v1463_v23  ;;  %v171_v63 = vmul.f32 %v135_v53, %v1473_v25 }
  0x1f   :  { %1245 = vrcp.f32 %v94_v33  ;;  %v1641_v37 = vpop.eup %1227  ;;  %v2699_v33 = vrot.slane %v1513_v39, 1  ;;  %v1665_v15 = vmul.f32 %v2702_v42, %v1533_v45  ;;  %v1687_v42 = vmul.f32 %v1609_v40, %v1634_v7 }
  0x20   :  { %1247 = vrcp.f32 %v95_v62  ;;  %v1654_v17 = vpop.eup %1229  ;;  %v2701_v62 = vrot.slane %v1528_v44, 1  ;;  %v588_v9 = vsub.f32 1.0, %v1629_v16  ;;  %v157_v5 = vmul.f32 %v1641_v37, %v133_v30 }
  0x21   :  { %v1652_v46 = vmul.f32 %v2699_v33, %v1507_v36  ;;  %2700 = vst [vmem:[#allocation39_spill] sm:$0xff] %v1654_v17  ;;  %1249 = vlog2.f32 %v1629_v16  ;;  %2703 = vst [vmem:[#allocation40_spill] sm:$0xff] %v1665_v15  ;;  %v1672_v33 = vpop.eup %1231  ;;  %v1716_v31 = vmul.f32 %v1629_v16, %v1447_v19  ;;  %v589_v30 = vsub.f32 1.0, %v1641_v37 }
  0x22   :  { %v1660_v56 = vmul.f32 %v2701_v62, %v1523_v43  ;;  %2706 = vst [vmem:[#allocation42_spill] sm:$0xff] %v1672_v33  ;;  %1251 = vlog2.f32 %v1641_v37  ;;  %v2709_v62 = vrot.slane %v1609_v40, 1  ;;  %2711 = vst [vmem:[#allocation45_spill] sm:$0xff] %v1687_v42  ;;  %v1689_v32 = vpop.eup %1233  ;;  %v159_v1 = vmul.f32 %v1672_v33, %v135_v53 }
  0x23   :  { %2712 = vst [vmem:[#allocation46_spill] sm:$0xff] %v1689_v32  ;;  %1253 = vlog2.f32 %v1654_v17  ;;  %v1695_v3 = vpop.eup %1235  ;;  %2716 = vst [vmem:[#allocation49_spill] sm:$0xff] %v1716_v31  ;;  %v160_v8 = vmul.f32 %v1689_v32, %v2717_v13  ;;  %v1727_v4 = vmul.f32 %v1641_v37, %v1458_v22  ;;  %v590_v53 = vsub.f32 1.0, %v1654_v17 }
  0x24   :  { %v1683_v11 = vmul.f32 %v2709_v62, %v1634_v7  ;;  %2713 = vst [vmem:[#allocation47_spill] sm:$0xff] %v1695_v3  ;;  %1255 = vlog2.f32 %v1672_v33  ;;  %v156_v62 = vmul.f32 %v1629_v16, %v132_v38  ;;  %v1701_v0 = vpop.eup %1237  ;;  %v2715_v38 = vrot.slane %v1468_v24, 1 }
  0x25   :  { %2714 = vst [vmem:[#allocation48_spill] sm:$0xff] %v1701_v0  ;;  %1257 = vlog2.f32 %v1689_v32  ;;  %v1707_v42 = vpop.eup %1239  ;;  %2718 = vst [vmem:[#allocation50_spill] sm:$0xff] %v1727_v4  ;;  %v2719_v16 = vrot.slane %v1502_v35, 1  ;;  %v591_v13 = vsub.f32 1.0, %v1672_v33  ;;  %v592_v37 = vsub.f32 1.0, %v1689_v32 }
  0x26   :  { %2710 = vst [vmem:[#allocation44_spill] sm:$0xff] %v1683_v11  ;;  %1259 = vlog2.f32 %v1695_v3  ;;  %v158_v2 = vmul.f32 %v1654_v17, %v2715_v38  ;;  %v1736_v60 = vsub.f32 %v156_v62, %v168_v20  ;;  %v1743_v54 = vsub.f32 %v157_v5, %v169_v49 }
  0x27   :  { %v1718_v10 = vpop.eup %1241  ;;  %1261 = vlog2.f32 %v1701_v0  ;;  %v161_v61 = vmul.f32 %v1695_v3, %v2719_v16  ;;  %v593_v4 = vsub.f32 1.0, %v1695_v3  ;;  %v1751_v20 = vsub.f32 %v159_v1, %v171_v63 }
  0x28   :  { %v1729_v38 = vpop.eup %1243  ;;  %1263 = vlog2.f32 %v1707_v42  ;;  %v1749_v47 = vsub.f32 %v158_v2, %v170_v59  ;;  %v594_v16 = vsub.f32 1.0, %v1701_v0  ;;  %v2722_v31 = vrot.slane %v1513_v39, 1 }
  0x29   :  { %v1738_v55 = vpop.eup %1245  ;;  %1265 = vlog2.f32 %v1718_v10  ;;  %2721 = vst [vmem:[#allocation52_spill] sm:$0xff] %v1751_v20  ;;  %v1760_v49 = vsub.f32 %v160_v8, %v172_v6  ;;  %v595_v1 = vsub.f32 1.0, %v1707_v42  ;;  %v1766_v2 = vsub.f32 %v161_v61, %v173_v29 }
  0x2a   :  { %v1745_v48 = vpop.eup %1247  ;;  %1267 = vlog2.f32 %v1729_v38  ;;  %v1758_v5 = vmul.f32 %v1701_v0, %v2722_v31  ;;  %v596_v3 = vsub.f32 1.0, %v1718_v10  ;;  %v597_v33 = vsub.f32 1.0, %v1729_v38 }
  0x2b   :  { %2720 = vst [vmem:[#allocation51_spill] sm:$0xff] %v1745_v48  ;;  %v1250_v62 = vpop.eup %1249  ;;  %1269 = vlog2.f32 %v1738_v55  ;;  %2723 = vst [vmem:[#allocation53_spill] sm:$0xff] %v1760_v49 }
  0x2c   :  { %v1252_v41 = vpop.eup %1251  ;;  %v1762_v32 = vmul.f32 0.6931472, %v1250_v62  ;;  %1271 = vlog2.f32 %v1745_v48  ;;  %2725 = vst [vmem:[#allocation55_spill] sm:$0xff] %v1766_v2  ;;  %v598_v62 = vsub.f32 1.0, %v1738_v55 }
  0x2d   :  { %v1254_v59 = vpop.eup %1253  ;;  %v1768_v63 = vmul.f32 0.6931472, %v1252_v41  ;;  %1273 = vlog2.f32 %v588_v9  ;;  %v599_v41 = vsub.f32 1.0, %v1745_v48 }
  0x2e   :  { %2724 = vst [vmem:[#allocation54_spill] sm:$0xff] %v1762_v32  ;;  %v1256_v31 = vpop.eup %1255  ;;  %v1772_v8 = vmul.f32 0.6931472, %v1254_v59  ;;  %v2583_v6 = vmax.f32 %v1762_v32, -100.0  ;;  %1275 = vlog2.f32 %v589_v30 }
  0x2f   :  { %2726 = vst [vmem:[#allocation56_spill] sm:$0xff] %v1768_v63  ;;  %v1258_v0 = vpop.eup %1257  ;;  %v1776_v17 = vmul.f32 0.6931472, %v1256_v31  ;;  %v2585_v29 = vmax.f32 %v1768_v63, -100.0  ;;  %1277 = vlog2.f32 %v590_v53 }
  0x30   :  { %2727 = vst [vmem:[#allocation57_spill] sm:$0xff] %v1772_v8  ;;  %v1260_v61 = vpop.eup %1259  ;;  %v1780_v2 = vmul.f32 0.6931472, %v1258_v0  ;;  %v2587_v9 = vmax.f32 %v1772_v8, -100.0  ;;  %1279 = vlog2.f32 %v591_v13  ;;  %v648_v59 = vrot.slane %v2583_v6, 4 }
  0x31   :  { %2728 = vst [vmem:[#allocation58_spill] sm:$0xff] %v1776_v17  ;;  %v1262_v49 = vpop.eup %1261  ;;  %v1785_v20 = vmul.f32 0.6931472, %v1260_v61  ;;  %v2589_v30 = vmax.f32 %v1776_v17, -100.0  ;;  %1281 = vlog2.f32 %v592_v37  ;;  %v649_v31 = vrot.slane %v2585_v29, 4 }
  0x32   :  { %2729 = vst [vmem:[#allocation59_spill] sm:$0xff] %v1780_v2  ;;  %v1264_v11 = vpop.eup %1263  ;;  %v1790_v53 = vmul.f32 0.6931472, %v1262_v49  ;;  %v2591_v0 = vmax.f32 %v1780_v2, -100.0  ;;  %1283 = vlog2.f32 %v593_v4  ;;  %v650_v13 = vrot.slane %v2587_v9, 4 }
  0x33   :  { %2730 = vst [vmem:[#allocation60_spill] sm:$0xff] %v1785_v20  ;;  %v1266_v32 = vpop.eup %1265  ;;  %v1795_v6 = vmul.f32 0.6931472, %v1264_v11  ;;  %v2593_v61 = vmax.f32 %v1785_v20, -100.0  ;;  %1285 = vlog2.f32 %v594_v16  ;;  %v651_v37 = vrot.slane %v2589_v30, 4 }
  0x34   :  { %2731 = vst [vmem:[#allocation61_spill] sm:$0xff] %v1790_v53  ;;  %v1268_v63 = vpop.eup %1267  ;;  %v1800_v29 = vmul.f32 0.6931472, %v1266_v32  ;;  %v2595_v49 = vmax.f32 %v1790_v53, -100.0  ;;  %1287 = vlog2.f32 %v595_v1  ;;  %v652_v4 = vrot.slane %v2591_v0, 4 }
  0x35   :  { %2732 = vst [vmem:[#allocation62_spill] sm:$0xff] %v1795_v6  ;;  %v1270_v8 = vpop.eup %1269  ;;  %v1805_v9 = vmul.f32 0.6931472, %v1268_v63  ;;  %v2597_v11 = vmax.f32 %v1795_v6, -100.0  ;;  %1289 = vlog2.f32 %v596_v3  ;;  %v653_v16 = vrot.slane %v2593_v61, 4 }
  0x36   :  { %2733 = vst [vmem:[#allocation63_spill] sm:$0xff] %v1800_v29  ;;  %v1272_v17 = vpop.eup %1271  ;;  %v1810_v30 = vmul.f32 0.6931472, %v1270_v8  ;;  %v2598_v32 = vmax.f32 %v1800_v29, -100.0  ;;  %1291 = vlog2.f32 %v597_v33  ;;  %v654_v1 = vrot.slane %v2595_v49, 4 }
  0x37   :  { %2734 = vst [vmem:[#allocation64_spill] sm:$0xff] %v1805_v9  ;;  %v1274_v2 = vpop.eup %1273  ;;  %v1815_v0 = vmul.f32 0.6931472, %v1272_v17  ;;  %v2600_v63 = vmax.f32 %v1805_v9, -100.0  ;;  %1293 = vlog2.f32 %v598_v62  ;;  %v655_v3 = vrot.slane %v2597_v11, 4 }
  0x38   :  { %2735 = vst [vmem:[#allocation65_spill] sm:$0xff] %v1810_v30  ;;  %v1276_v20 = vpop.eup %1275  ;;  %v2602_v61 = vmax.f32 %v1810_v30, -100.0  ;;  %v1821_v8 = vmul.f32 0.6931472, %v1274_v2  ;;  %1295 = vlog2.f32 %v599_v41  ;;  %v656_v33 = vrot.slane %v2598_v32, 4 }
  0x39   :  { %2736 = vst [vmem:[#allocation66_spill] sm:$0xff] %v1815_v0  ;;  %v1278_v53 = vpop.eup %1277  ;;  %v1826_v17 = vmul.f32 0.6931472, %v1276_v20  ;;  %v657_v62 = vrot.slane %v2600_v63, 4  ;;  %v1831_v6 = vmul.f32 %v648_v59, %v1447_v19  ;;  %v1839_v32 = vmul.f32 %v649_v31, %v1458_v22 }
  0x3a   :  { %2737 = vst [vmem:[#allocation67_spill] sm:$0xff] %v1821_v8  ;;  %v1280_v11 = vpop.eup %1279  ;;  %v1833_v12 = vmul.f32 0.6931472, %v1278_v53  ;;  %v658_v41 = vrot.slane %v2602_v61, 4  ;;  %v2741_v63 = vmax.f32 %v1815_v0, -100.0  ;;  %v674_v29 = vmul.f32 %v650_v13, %v1468_v24 }
  0x3b   :  { %2738 = vst [vmem:[#allocation68_spill] sm:$0xff] %v1826_v17  ;;  %v1282_v49 = vpop.eup %1281  ;;  %v1841_v20 = vmul.f32 0.6931472, %v1280_v11  ;;  %v675_v61 = vmul.f32 %v651_v37, %v1478_v26  ;;  %v676_v31 = vmul.f32 %v652_v4, %v1488_v28  ;;  %v677_v9 = vmul.f32 %v653_v16, %v1502_v35 }
  0x3c   :  { %2739 = vst [vmem:[#allocation69_spill] sm:$0xff] %v1833_v12  ;;  %v659_v59 = vrot.slane %v2741_v63, 4  ;;  %v1284_v53 = vpop.eup %1283  ;;  %v1847_v14 = vmul.f32 0.6931472, %v1282_v49  ;;  %v678_v63 = vmul.f32 %v654_v1, %v1513_v39  ;;  %v679_v2 = vmul.f32 %v655_v3, %v1528_v44 }
  0x3d   :  { %2740 = vst [vmem:[#allocation70_spill] sm:$0xff] %v1841_v20  ;;  %v1286_v30 = vpop.eup %1285  ;;  %v1852_v15 = vmul.f32 0.6931472, %v1284_v53  ;;  %v680_v37 = vmul.f32 %v656_v33, %v1552_v51  ;;  %v681_v11 = vmul.f32 %v657_v62, %v1557_v52  ;;  %v682_v16 = vmul.f32 %v658_v41, %v1575_v58 }
  0x3e   :  { %2742 = vst [vmem:[#allocation71_spill] sm:$0xff] %v1847_v14  ;;  %v1288_v0 = vpop.eup %1287  ;;  %v1857_v13 = vmul.f32 0.6931472, %v1286_v30  ;;  %v683_v49 = vmul.f32 %v659_v59, %v1609_v40  ;;  %v2747_v3 = vmax.f32 %v1821_v8, -100.0  ;;  %v2749_v53 = vmax.f32 %v1826_v17, -100.0 }
  0x3f   :  { %2743 = vst [vmem:[#allocation72_spill] sm:$0xff] %v1852_v15  ;;  %v1290_v7 = vpop.eup %1289  ;;  %v1862_v4 = vmul.f32 0.6931472, %v1288_v0  ;;  %v2750_v41 = vmax.f32 %v1833_v12, -100.0  ;;  %v2752_v59 = vmax.f32 %v1841_v20, -100.0 }
  0x40   :  { %2744 = vst [vmem:[#allocation73_spill] sm:$0xff] %v1857_v13  ;;  %v1292_v57 = vpop.eup %1291  ;;  %v1867_v1 = vmul.f32 0.6931472, %v1290_v7  ;;  %v708_v48 = vrot.slane %v2747_v3, 4  ;;  %v709_v62 = vrot.slane %v2749_v53, 4  ;;  %v2753_v3 = vmax.f32 %v1847_v14, -100.0 }
  0x41   :  { %2745 = vst [vmem:[#allocation74_spill] sm:$0xff] %v1862_v4  ;;  %v1294_v33 = vpop.eup %1293  ;;  %v1873_v50 = vmul.f32 0.6931472, %v1292_v57  ;;  %v710_v45 = vrot.slane %v2750_v41, 4  ;;  %v711_v8 = vrot.slane %v2752_v59, 4  ;;  %v2755_v53 = vmax.f32 %v1852_v15, -100.0 }
  0x42   :  { %2746 = vst [vmem:[#allocation75_spill] sm:$0xff] %v1867_v1  ;;  %v1296_v7 = vpop.eup %1295  ;;  %v1880_v43 = vmul.f32 0.6931472, %v1294_v33  ;;  %v712_v57 = vrot.slane %v2753_v3, 4  ;;  %v2756_v41 = vmax.f32 %v1857_v13, -100.0  ;;  %v2757_v30 = vmax.f32 %v1862_v4, -100.0 }
  0x43   :  { %2748 = vst [vmem:[#allocation76_spill] sm:$0xff] %v1873_v50  ;;  %v1887_v36 = vmul.f32 0.6931472, %v1296_v7  ;;  %v2632_v0 = vmax.f32 %v1873_v50, -100.0  ;;  %v713_v17 = vrot.slane %v2755_v53, 4  ;;  %v2758_v59 = vmax.f32 %v1867_v1, -100.0 }
  0x44   :  { %2751 = vst [vmem:[#allocation77_spill] sm:$0xff] %v1880_v43  ;;  %v714_v12 = vrot.slane %v2756_v41, 4  ;;  %v715_v34 = vrot.slane %v2757_v30, 4  ;;  %v2759_v3 = vsub.f32 1.0, %v1447_v19  ;;  %v2760_v53 = vsub.f32 1.0, %v1458_v22 }
  0x45   :  { %2754 = vst [vmem:[#allocation78_spill] sm:$0xff] %v1887_v36  ;;  %v716_v20 = vrot.slane %v2758_v59, 4  ;;  %v717_v15 = vrot.slane %v2632_v0, 4  ;;  %v2761_v41 = vsub.f32 1.0, %v1468_v24  ;;  %v2762_v4 = vmax.f32 %v1880_v43, -100.0 }
  0x46   :  { %v732_v7 = vmul.f32 %v708_v48, %v2759_v3  ;;  %v733_v13 = vmul.f32 %v709_v62, %v2760_v53  ;;  %v2763_v1 = vsub.f32 1.0, %v1478_v26  ;;  %v2764_v19 = vsub.f32 1.0, %v1488_v28 }
  0x47   :  { %v734_v33 = vmul.f32 %v710_v45, %v2761_v41  ;;  %v718_v30 = vrot.slane %v2762_v4, 4  ;;  %v2765_v3 = vsub.f32 1.0, %v1502_v35  ;;  %v2766_v0 = vmax.f32 %v1887_v36, -100.0 }
  0x48   :  { %v735_v59 = vmul.f32 %v711_v8, %v2763_v1  ;;  %v736_v48 = vmul.f32 %v712_v57, %v2764_v19  ;;  %v2767_v62 = vsub.f32 1.0, %v1513_v39  ;;  %v2768_v45 = vsub.f32 1.0, %v1528_v44 }
  0x49   :  { %v737_v14 = vmul.f32 %v713_v17, %v2765_v3  ;;  %v719_v50 = vrot.slane %v2766_v0, 4  ;;  %v2769_v4 = vsub.f32 1.0, %v1552_v51  ;;  %v2770_v8 = vsub.f32 1.0, %v1557_v52 }
  0x4a   :  { %v738_v53 = vmul.f32 %v714_v12, %v2767_v62  ;;  %v739_v41 = vmul.f32 %v715_v34, %v2768_v45  ;;  %v2771_v19 = vsub.f32 1.0, %v1575_v58  ;;  %v744_v17 = vadd.f32 %v732_v7, %v1831_v6 }
  0x4b   :  { %v740_v43 = vmul.f32 %v716_v20, %v2769_v4  ;;  %v741_v1 = vmul.f32 %v717_v15, %v2770_v8  ;;  %v745_v3 = vadd.f32 %v733_v13, %v1839_v32  ;;  %v2772_v0 = vsub.f32 1.0, %v1609_v40 }
  0x4c   :  { %v742_v57 = vmul.f32 %v718_v30, %v2771_v19  ;;  %v746_v12 = vadd.f32 %v734_v33, %v674_v29  ;;  %v747_v62 = vadd.f32 %v735_v59, %v675_v61  ;;  %v748_v22 = vadd.f32 %v736_v48, %v676_v31 }
  0x4d   :  { %v743_v36 = vmul.f32 %v719_v50, %v2772_v0  ;;  %v749_v34 = vadd.f32 %v737_v14, %v677_v9  ;;  %v750_v45 = vadd.f32 %v738_v53, %v678_v63  ;;  %v751_v39 = vadd.f32 %v739_v41, %v679_v2 }
  0x4e   :  { %v752_v20 = vadd.f32 %v740_v43, %v680_v37  ;;  %v753_v4 = vadd.f32 %v741_v1, %v681_v11  ;;  %v754_v35 = vadd.f32 %v742_v57, %v682_v16  ;;  %v756_v15 = vsub.f32 0.0, %v744_v17 }
  0x4f   :  { %v1934_v30 = vmul.f32 %v1736_v60, %v1736_v60  ;;  %v757_v6 = vsub.f32 0.0, %v745_v3  ;;  %v758_v7 = vsub.f32 0.0, %v746_v12  ;;  %v759_v32 = vsub.f32 0.0, %v747_v62 }
  0x50   :  { %v760_v13 = vsub.f32 0.0, %v748_v22  ;;  %v755_v50 = vadd.f32 %v743_v36, %v683_v49  ;;  %v761_v29 = vsub.f32 0.0, %v749_v34  ;;  %v762_v61 = vsub.f32 0.0, %v750_v45 }
  0x51   :  { %v1938_v14 = vmul.f32 %v1743_v54, %v1743_v54  ;;  %v763_v43 = vsub.f32 0.0, %v751_v39  ;;  %v764_v9 = vsub.f32 0.0, %v752_v20  ;;  %v780_v2 = vrot.slane %v756_v15, 1 }
  0x52   :  { %v2773_v31 = vrot.slane %v1528_v44, 1  ;;  %v765_v11 = vsub.f32 0.0, %v753_v4  ;;  %v781_v63 = vrot.slane %v757_v6, 1  ;;  %v782_v37 = vrot.slane %v758_v7, 1  ;;  %v2777_v6 = vld [vmem:[#allocation19_spill] sm:$0xff] }
  0x53   :  { %v783_v16 = vrot.slane %v759_v32, 1  ;;  %v766_v22 = vsub.f32 0.0, %v754_v35  ;;  %v784_v33 = vrot.slane %v760_v13, 1  ;;  %v2774_v36 = vrot.slane %v1552_v51, 1  ;;  %v2778_v32 = vld [vmem:[#allocation21_spill] sm:$0xff] }
  0x54   :  { %v163_v60 = vmul.f32 %v1707_v42, %v2773_v31  ;;  %v186_v54 = vsub.f32 %v1758_v5, %v1652_v46  ;;  %v767_v39 = vsub.f32 0.0, %v755_v50  ;;  %v785_v59 = vrot.slane %v761_v29, 1  ;;  %v2779_v50 = vld [vmem:[#allocation24_spill] sm:$0xff] }
  0x55   :  { %v164_v49 = vmul.f32 %v1718_v10, %v2774_v36  ;;  %v786_v48 = vrot.slane %v762_v61, 1  ;;  %v804_v53 = vmul.f32 %v780_v2, %v1442_v18  ;;  %v787_v41 = vrot.slane %v763_v43, 1  ;;  %v2780_v61 = vld [vmem:[#allocation25_spill] sm:$0xff]  ;;  %v2785_v36 = vld [vmem:[#allocation38_spill] sm:$0xff] }
  0x56   :  { %v805_v8 = vmul.f32 %v781_v63, %v1453_v21  ;;  %v806_v1 = vmul.f32 %v782_v37, %v1463_v23  ;;  %v807_v35 = vmul.f32 %v783_v16, %v1473_v25  ;;  %v788_v19 = vrot.slane %v764_v9, 1  ;;  %v2781_v9 = vld [vmem:[#allocation28_spill] sm:$0xff]  ;;  %v2784_v63 = vld [vmem:[#allocation31_spill] sm:$0xff] }
  0x57   :  { %v789_v57 = vrot.slane %v765_v11, 1  ;;  %v2775_v17 = vrot.slane %v1557_v52, 1  ;;  %v1957_v46 = vmul.f32 %v1749_v47, %v1749_v47  ;;  %v790_v5 = vrot.slane %v766_v22, 1 }
  0x58   :  { %v808_v0 = vmul.f32 %v784_v33, %v1483_v27  ;;  %v996_v12 = vrot.slane %v804_v53, 7  ;;  %v187_v62 = vsub.f32 %v163_v60, %v1660_v56  ;;  %v791_v34 = vrot.slane %v767_v39, 1  ;;  %v2783_v60 = vld [vmem:[#allocation51_spill] sm:$0xff] }
  0x59   :  { %v165_v3 = vmul.f32 %v1729_v38, %v2775_v17  ;;  %v997_v45 = vrot.slane %v805_v8, 7  ;;  %v998_v20 = vrot.slane %v806_v1, 7  ;;  %v2776_v4 = vrot.slane %v1575_v58, 1 }
  0x5a   :  { %v809_v7 = vmul.f32 %v785_v59, %v2777_v6  ;;  %v810_v13 = vmul.f32 %v786_v48, %v2778_v32  ;;  %v811_v47 = vmul.f32 %v787_v41, %v2779_v50  ;;  %v999_v29 = vrot.slane %v807_v35, 7  ;;  %v2786_v48 = vld [vmem:[#allocation40_spill] sm:$0xff]  ;;  %v2787_v41 = vld [vmem:[#allocation41_spill] sm:$0xff] }
  0x5b   :  { %v166_v15 = vmul.f32 %v1738_v55, %v2776_v4  ;;  %v812_v43 = vmul.f32 %v788_v19, %v2780_v61  ;;  %v813_v2 = vmul.f32 %v789_v57, %v2781_v9  ;;  %v1021_v56 = vsel %vm1020_vm0, %v996_v12, 0.0  ;;  %v2812_v9 = vld [vmem:[#allocation33_spill] sm:$0xff]  ;;  %v2814_v61 = vld [vmem:[#allocation35_spill] sm:$0xff] }
  0x5c   :  { %v2782_v31 = vrot.slane %v1609_v40, 1  ;;  %v814_v37 = vmul.f32 %v790_v5, %v2784_v63  ;;  %v1000_v16 = vrot.slane %v808_v0, 7  ;;  %v1022_v22 = vsel %vm1020_vm0, %v997_v45, 0.0  ;;  %v2788_v0 = vld [vmem:[#allocation43_spill] sm:$0xff] }
  0x5d   :  { %v1024_v33 = vsel %vm1020_vm0, %v998_v20, 0.0  ;;  %v815_v39 = vmul.f32 %v791_v34, %v2785_v36  ;;  %v1023_v59 = vadd.f32 %v1022_v22, %v1021_v56  ;;  %v188_v53 = vsub.f32 %v164_v49, %v2786_v48  ;;  %v2790_v56 = vld [vmem:[#allocation52_spill] sm:$0xff] }
  0x5e   :  { %v167_v11 = vmul.f32 %v2783_v60, %v2782_v31  ;;  %v189_v8 = vsub.f32 %v165_v3, %v2787_v41  ;;  %v1001_v1 = vrot.slane %v809_v7, 7  ;;  %v1002_v35 = vrot.slane %v810_v13, 7  ;;  %v2789_v31 = vld [vmem:[#allocation44_spill] sm:$0xff]  ;;  %v2791_v7 = vld [vmem:[#allocation53_spill] sm:$0xff] }
  0x5f   :  { %v1003_v19 = vrot.slane %v811_v47, 7  ;;  %v1026_v57 = vsel %vm1020_vm0, %v999_v29, 0.0  ;;  %v1004_v17 = vrot.slane %v812_v43, 7  ;;  %v1005_v12 = vrot.slane %v813_v2, 7  ;;  %v2793_v47 = vld [vmem:[#allocation55_spill] sm:$0xff]  ;;  %v2811_v36 = vld [vmem:[#allocation32_spill] sm:$0xff] }
  0x60   :  { %v1025_v5 = vadd.f32 %v1024_v33, %v1023_v59  ;;  %v190_v4 = vsub.f32 %v166_v15, %v2788_v0  ;;  %v1006_v45 = vrot.slane %v814_v37, 7  ;;  %v1028_v20 = vsel %vm1020_vm0, %v1000_v16, 0.0  ;;  %v2796_v59 = vld [vmem:[#allocation39_spill] sm:$0xff] }
  0x61   :  { %v191_v34 = vsub.f32 %v167_v11, %v2789_v31  ;;  %v1985_v49 = vmul.f32 %v2790_v56, %v2790_v56  ;;  %v1989_v13 = vmul.f32 %v2791_v7, %v2791_v7  ;;  %v1993_v29 = vmul.f32 %v2793_v47, %v2793_v47  ;;  %v2802_v31 = vld [vmem:[#allocation48_spill] sm:$0xff] }
  0x62   :  { %v1027_v3 = vadd.f32 %v1026_v57, %v1025_v5  ;;  %v1995_v43 = vmul.f32 %v186_v54, %v186_v54  ;;  %v1007_v15 = vrot.slane %v815_v39, 7  ;;  %v1030_v2 = vsel %vm1020_vm0, %v1001_v1, 0.0  ;;  %v2797_v54 = vld [vmem:[#allocation42_spill] sm:$0xff]  ;;  %v2799_v5 = vld [vmem:[#allocation20_spill] sm:$0xff] }
  0x63   :  { %2792 = vst [vmem:[#allocation19_spill] sm:$0xff] %v1989_v13  ;;  %2794 = vst [vmem:[#allocation21_spill] sm:$0xff] %v1993_v29  ;;  %v1032_v11 = vsel %vm1020_vm0, %v1002_v35, 0.0  ;;  %v1034_v37 = vsel %vm1020_vm0, %v1003_v19, 0.0  ;;  %v1036_v22 = vsel %vm1020_vm0, %v1004_v17, 0.0  ;;  %v1038_v33 = vsel %vm1020_vm0, %v1005_v12, 0.0 }
  0x64   :  { %2795 = vst [vmem:[#allocation24_spill] sm:$0xff] %v1995_v43  ;;  %v1029_v16 = vadd.f32 %v1028_v20, %v1027_v3  ;;  %v206_v48 = vmul.f32 %v2796_v59, %v1468_v24  ;;  %v1040_v41 = vsel %vm1020_vm0, %v1006_v45, 0.0  ;;  %v207_v57 = vmul.f32 %v2797_v54, %v1478_v26  ;;  %v2798_v39 = vld [vmem:[#allocation46_spill] sm:$0xff]  ;;  %v2800_v35 = vld [vmem:[#allocation47_spill] sm:$0xff]  ;;  %v2804_v59 = vld [vmem:[#allocation49_spill] sm:$0xff] }
  0x65   :  { %v208_v1 = vmul.f32 %v2798_v39, %v1488_v28  ;;  %v209_v0 = vmul.f32 %v2800_v35, %v2799_v5  ;;  %v2801_v20 = vld [vmem:[#allocation22_spill] sm:$0xff]  ;;  %v211_v12 = vmul.f32 %v1707_v42, %v1528_v44  ;;  %v212_v56 = vmul.f32 %v1718_v10, %v1552_v51 }
  0x66   :  { %v1031_v19 = vadd.f32 %v1030_v2, %v1029_v16  ;;  %v210_v17 = vmul.f32 %v2802_v31, %v2801_v20  ;;  %v1042_v45 = vsel %vm1020_vm0, %v1007_v15, 0.0  ;;  %v213_v3 = vmul.f32 %v1729_v38, %v1557_v52  ;;  %v2803_v16 = vld [vmem:[#allocation23_spill] sm:$0xff]  ;;  %v2805_v39 = vld [vmem:[#allocation26_spill] sm:$0xff]  ;;  %v2809_v15 = vld [vmem:[#allocation29_spill] sm:$0xff] }
  0x67   :  { %v214_v7 = vmul.f32 %v1738_v55, %v1575_v58  ;;  %v215_v47 = vmul.f32 %v2783_v60, %v1609_v40  ;;  %v228_v54 = vsub.f32 %v2804_v59, %v2803_v16  ;;  %v2806_v42 = vld [vmem:[#allocation50_spill] sm:$0xff]  ;;  %v2807_v31 = vld [vmem:[#allocation27_spill] sm:$0xff]  ;;  %v2029_v43 = vmul.f32 %v187_v62, %v187_v62 }
  0x68   :  { %v1033_v2 = vadd.f32 %v1032_v11, %v1031_v19  ;;  %v229_v35 = vsub.f32 %v2806_v42, %v2805_v39  ;;  %v230_v10 = vsub.f32 %v206_v48, %v2807_v31  ;;  %v231_v29 = vsub.f32 %v207_v57, %v2809_v15  ;;  %v2810_v38 = vld [vmem:[#allocation30_spill] sm:$0xff]  ;;  %v2815_v39 = vld [vmem:[#allocation36_spill] sm:$0xff]  ;;  %v2816_v48 = vld [vmem:[#allocation37_spill] sm:$0xff] }
  0x69   :  { %2808 = vst [vmem:[#allocation51_spill] sm:$0xff] %v2029_v43  ;;  %v232_v13 = vsub.f32 %v208_v1, %v2810_v38  ;;  %v233_v55 = vsub.f32 %v209_v0, %v2811_v36  ;;  %v234_v60 = vsub.f32 %v210_v17, %v2812_v9  ;;  %v2813_v11 = vld [vmem:[#allocation34_spill] sm:$0xff]  ;;  %v236_v16 = vsub.f32 %v212_v56, %v2814_v61  ;;  %v2817_v31 = vld [vmem:[#allocation45_spill] sm:$0xff] }
  0x6a   :  { %v1035_v63 = vadd.f32 %v1034_v37, %v1033_v2  ;;  %v235_v19 = vsub.f32 %v211_v12, %v2813_v11  ;;  %v2037_v59 = vmul.f32 %v188_v53, %v188_v53  ;;  %v237_v42 = vsub.f32 %v213_v3, %v2815_v39 }
  0x6b   :  { %v238_v62 = vsub.f32 %v214_v7, %v2816_v48  ;;  %v239_v43 = vsub.f32 %v215_v47, %v2817_v31  ;;  %v240_v15 = vmul.f32 %v228_v54, %v228_v54  ;;  %v241_v1 = vmul.f32 %v229_v35, %v229_v35  ;;  %v2819_v31 = vld [vmem:[#allocation17_spill] sm:$0xff] }
  0x6c   :  { %v1037_v57 = vadd.f32 %v1036_v22, %v1035_v63  ;;  %v242_v38 = vmul.f32 %v230_v10, %v230_v10  ;;  %v2042_v36 = vmul.f32 %v189_v8, %v189_v8  ;;  %v243_v37 = vmul.f32 %v231_v29, %v231_v29 }
  0x6d   :  { %v2044_v9 = vmul.f32 %v232_v13, %v232_v13  ;;  %v2046_v0 = vmul.f32 %v233_v55, %v233_v55  ;;  %v2048_v53 = vmul.f32 %v234_v60, %v234_v60  ;;  %v2050_v17 = vmul.f32 %v235_v19, %v235_v19 }
  0x6e   :  { %v1039_v61 = vadd.f32 %v1038_v33, %v1037_v57  ;;  %v2052_v12 = vmul.f32 %v236_v16, %v236_v16  ;;  %v2054_v56 = vmul.f32 %v190_v4, %v190_v4  ;;  %v2056_v63 = vmul.f32 %v237_v42, %v237_v42 }
  0x6f   :  { %v2058_v22 = vmul.f32 %v238_v62, %v238_v62  ;;  %v2060_v8 = vmul.f32 %v239_v43, %v239_v43  ;;  %v264_v13 = vrot.slane %v240_v15, 1  ;;  %v265_v3 = vrot.slane %v241_v1, 1  ;;  %v2818_v62 = vld [vmem:[#allocation5_spill] sm:$0xff]  ;;  %v2821_v15 = vld [vmem:[#allocation6_spill] sm:$0xff] }
  0x70   :  { %v1041_v29 = vadd.f32 %v1040_v41, %v1039_v61  ;;  %v266_v7 = vrot.slane %v242_v38, 1  ;;  %v2062_v47 = vmul.f32 %v191_v34, %v191_v34  ;;  %v267_v33 = vrot.slane %v243_v37, 1 }
  0x71   :  { %v268_v2 = vrot.slane %v2044_v9, 1  ;;  %v269_v54 = vrot.slane %v2046_v0, 1  ;;  %v270_v4 = vrot.slane %v2048_v53, 1  ;;  %v271_v10 = vrot.slane %v2050_v17, 1  ;;  %v2826_v9 = vld [vmem:[#allocation8_spill] sm:$0xff]  ;;  %v2828_v0 = vld [vmem:[#allocation9_spill] sm:$0xff] }
  0x72   :  { %v1043_v35 = vadd.f32 %v1042_v45, %v1041_v29  ;;  %v272_v55 = vrot.slane %v2052_v12, 1  ;;  %v273_v43 = vrot.slane %v2056_v63, 1  ;;  %v274_v41 = vrot.slane %v2058_v22, 1  ;;  %v2830_v17 = vld [vmem:[#allocation10_spill] sm:$0xff]  ;;  %v2832_v22 = vld [vmem:[#allocation11_spill] sm:$0xff] }
  0x73   :  { %v275_v60 = vrot.slane %v2060_v8, 1  ;;  %v306_v34 = vrot.slane %v2801_v20, 7  ;;  %v2074_v11 = vadd.f32 %v264_v13, %v1934_v30  ;;  %v2077_v45 = vadd.f32 %v265_v3, %v1938_v14  ;;  %v2833_v13 = vld [vmem:[#allocation12_spill] sm:$0xff]  ;;  %v2315_v8 = vld [vmem:[%s2563_s1 + $0x48] sm:$0xff] }
  0x74   :  { %1044 = vadd.xlane.f32.xlu0 %v1043_v35  ;;  %v2080_v19 = vadd.f32 %v266_v7, %v1957_v46  ;;  %v307_v16 = vrot.slane %v1528_v44, 7  ;;  %v2084_v39 = vadd.f32 %v267_v33, %v1985_v49  ;;  %v308_v42 = vrot.slane %v1552_v51, 7  ;;  %v2822_v46 = vld [vmem:[#allocation18_spill] sm:$0xff]  ;;  %v2824_v44 = vld [vmem:[#allocation7_spill] sm:$0xff]  ;;  %2857 = vst [vmem:[#allocation53_spill] sm:$0xff] %v2315_v8 }
  0x75   :  { %v309_v48 = vrot.slane %v1557_v52, 7  ;;  %v310_v20 = vrot.slane %v1575_v58, 7  ;;  %v311_v30 = vrot.slane %v1609_v40, 7  ;;  %v2820_v14 = vrot.slane %v2819_v31, 7 }
  0x76   :  { %v2823_v1 = vrot.slane %v2822_v46, 7  ;;  %v2825_v49 = vrot.slane %v1468_v24, 7  ;;  %v2827_v51 = vrot.slane %v1478_v26, 7  ;;  %v2829_v61 = vrot.slane %v1488_v28, 7  ;;  %v2840_v46 = vld [vmem:[#allocation13_spill] sm:$0xff]  ;;  %v2842_v24 = vld [vmem:[#allocation15_spill] sm:$0xff] }
  0x77   :  { %v324_v57 = vmul.f32 %v2820_v14, %v2818_v62  ;;  %v2831_v12 = vrot.slane %v2799_v5, 7  ;;  %v330_v29 = vmul.f32 %v306_v34, %v2832_v22  ;;  %v331_v3 = vmul.f32 %v307_v16, %v2833_v13  ;;  %v2843_v26 = vld [vmem:[#allocation16_spill] sm:$0xff]  ;;  %v2846_v13 = vld [vmem:[#allocation31_spill] sm:$0xff]  ;;  %v2847_v5 = vld [vmem:[#allocation38_spill] sm:$0xff] }
  0x78   :  { %v325_v38 = vmul.f32 %v2823_v1, %v2821_v15  ;;  %v326_v37 = vmul.f32 %v2825_v49, %v2824_v44  ;;  %v327_v52 = vmul.f32 %v2827_v51, %v2826_v9  ;;  %v328_v53 = vmul.f32 %v2829_v61, %v2828_v0  ;;  %v2841_v0 = vld [vmem:[#allocation14_spill] sm:$0xff]  ;;  %v2845_v28 = vld [vmem:[#allocation28_spill] sm:$0xff] }
  0x79   :  { %v329_v63 = vmul.f32 %v2831_v12, %v2830_v17  ;;  %v2834_v7 = vmov %v2820_v14  ;;  %v2835_v35 = vmov %v2823_v1  ;;  %v2836_v14 = vmov %v2825_v49 }
  0x7a   :  { %v336_v33 = vmul.f32 %v2834_v7, %v1442_v18  ;;  %v337_v62 = vmul.f32 %v2835_v35, %v1453_v21  ;;  %v338_v15 = vmul.f32 %v2836_v14, %v1463_v23  ;;  %v2837_v1 = vmov %v2827_v51 }
  0x7b   :  { %v339_v44 = vmul.f32 %v2837_v1, %v1473_v25  ;;  %v2838_v49 = vmov %v2829_v61  ;;  %v2839_v31 = vmov %v2831_v12  ;;  %v342_v51 = vmul.f32 %v306_v34, %v2778_v32  ;;  %v2844_v12 = vld [vmem:[#allocation25_spill] sm:$0xff] }
  0x7c   :  { %v340_v9 = vmul.f32 %v2838_v49, %v1483_v27  ;;  %v341_v18 = vmul.f32 %v2839_v31, %v2777_v6  ;;  %v332_v21 = vmul.f32 %v308_v42, %v2840_v46  ;;  %v333_v61 = vmul.f32 %v309_v48, %v2841_v0  ;;  %v2848_v46 = vld [vmem:[#allocation19_spill] sm:$0xff] }
  0x7d   :  { %v334_v23 = vmul.f32 %v310_v20, %v2842_v24  ;;  %v343_v17 = vmul.f32 %v307_v16, %v2779_v50  ;;  %v335_v25 = vmul.f32 %v311_v30, %v2843_v26  ;;  %v344_v22 = vmul.f32 %v308_v42, %v2844_v12  ;;  %v2849_v50 = vld [vmem:[#allocation21_spill] sm:$0xff]  ;;  %v2850_v42 = vld [vmem:[#allocation24_spill] sm:$0xff] }
  0x7e   :  { %v345_v27 = vmul.f32 %v309_v48, %v2845_v28  ;;  %v346_v7 = vmul.f32 %v310_v20, %v2846_v13  ;;  %v347_v6 = vmul.f32 %v311_v30, %v2847_v5  ;;  %v348_v35 = vsub.f32 %v324_v57, %v336_v33  ;;  %v2851_v20 = vld [vmem:[#allocation51_spill] sm:$0xff]  ;;  %v2305_v12 = vld [vmem:[%s2563_s1 + $0x40] sm:$0xff] }
  0x7f   :  { %v349_v32 = vsub.f32 %v325_v38, %v337_v62  ;;  %v350_v34 = vsub.f32 %v326_v37, %v338_v15  ;;  %v351_v14 = vsub.f32 %v327_v52, %v339_v44  ;;  %v352_v1 = vsub.f32 %v328_v53, %v340_v9  ;;  %2856 = vst [vmem:[#allocation52_spill] sm:$0xff] %v2305_v12 }
  0x80   :  { %v353_v49 = vsub.f32 %v329_v63, %v341_v18  ;;  %v354_v31 = vsub.f32 %v330_v29, %v342_v51  ;;  %v2139_v0 = vadd.f32 %v268_v2, %v2848_v46  ;;  %v2142_v16 = vadd.f32 %v269_v54, %v2849_v50  ;;  %v2193_v51 = vld [vmem:[%s2563_s1 + $0x10] sm:$0x3]  ;;  %v2256_v50 = vld [vmem:[%s2563_s1 + $0x98] sm:$0x3] }
  0x81   :  { %v2145_v24 = vadd.f32 %v270_v4, %v2850_v42  ;;  %v355_v48 = vsub.f32 %v331_v3, %v343_v17  ;;  %v2148_v26 = vadd.f32 %v271_v10, %v2851_v20  ;;  %v356_v30 = vsub.f32 %v332_v21, %v344_v22  ;;  %v2205_v17 = vld [vmem:[%s2563_s1 + $0x30] sm:$0x3]  ;;  %v2212_v22 = vld [vmem:[%s2563_s1 + $0x38] sm:$0x3]  ;;  %v1307_v20 = vld [vmem:[%s2562_s0] sm:$0xff] }
  0x82   :  { %v357_v57 = vsub.f32 %v333_v61, %v345_v27  ;;  %v358_v38 = vsub.f32 %v334_v23, %v346_v7  ;;  %v359_v37 = vsub.f32 %v335_v25, %v347_v6  ;;  %v360_v52 = vmul.f32 %v348_v35, %v348_v35  ;;  %v2199_v61 = vld [vmem:[%s2563_s1 + $0x18] sm:$0x3]  ;;  %v2218_v27 = vld [vmem:[%s2563_s1 + $0x50] sm:$0x3]  ;;  %v2299_v35 = vld [vmem:[%s2563_s1 + $0x28] sm:$0xff] }
  0x83   :  { %v361_v53 = vmul.f32 %v349_v32, %v349_v32  ;;  %v2150_v63 = vmul.f32 %v350_v34, %v350_v34  ;;  %v2152_v2 = vmul.f32 %v351_v14, %v351_v14  ;;  %v2154_v29 = vmul.f32 %v352_v1, %v352_v1  ;;  %v2224_v7 = vld [vmem:[%s2563_s1 + $0x58] sm:$0x3]  ;;  %v2238_v1 = vld [vmem:[%s2563_s1 + $0x70] sm:$0x3]  ;;  %2855 = vst [vmem:[#allocation44_spill] sm:$0xff] %v2299_v35 }
  0x84   :  { %v2156_v54 = vmul.f32 %v353_v49, %v353_v49  ;;  %v2158_v4 = vmul.f32 %v354_v31, %v354_v31  ;;  %v2161_v3 = vadd.f32 %v272_v55, %v2037_v59  ;;  %v2164_v10 = vadd.f32 %v273_v43, %v2042_v36  ;;  %v2244_v31 = vld [vmem:[%s2563_s1 + $0x78] sm:$0x3]  ;;  %v2331_v43 = vld [vmem:[%s2563_s1 + $0x68] sm:$0xff] }
  0x85   :  { %v2167_v33 = vadd.f32 %v274_v41, %v2054_v56  ;;  %v2169_v62 = vmul.f32 %v355_v48, %v355_v48  ;;  %v2174_v15 = vadd.f32 %v275_v60, %v2062_v47  ;;  %v2176_v44 = vmul.f32 %v356_v30, %v356_v30  ;;  %v2321_v41 = vld [vmem:[%s2563_s1 + $0x60] sm:$0xff] }
  0x86   :  { %v2178_v9 = vmul.f32 %v357_v57, %v357_v57  ;;  %v2180_v18 = vmul.f32 %v358_v38, %v358_v38  ;;  %v2182_v59 = vmul.f32 %v359_v37, %v359_v37  ;;  %v384_v36 = vrot.slane %v360_v52, 2  ;;  %v1308_v57 = vld [vmem:[%s2562_s0 + $0x8] sm:$0xff]  ;;  %v1309_v37 = vld [vmem:[%s2562_s0 + $0x10] sm:$0xff]  ;;  %2858 = vst [vmem:[#allocation55_spill] sm:$0xff] %v2321_v41 }
  0x87   :  { %v385_v55 = vrot.slane %v361_v53, 2  ;;  %v386_v56 = vrot.slane %v2150_v63, 2  ;;  %v420_v21 = vrot.slane %v2193_v51, 6  ;;  %v421_v23 = vrot.slane %v2199_v61, 6  ;;  %v1310_v53 = vld [vmem:[%s2562_s0 + $0x18] sm:$0xff]  ;;  %v1311_v63 = vld [vmem:[%s2562_s0 + $0x20] sm:$0xff] }
  0x88   :  { %v422_v25 = vrot.slane %v2205_v17, 6  ;;  %v423_v28 = vrot.slane %v2212_v22, 6  ;;  %v424_v13 = vrot.slane %v2218_v27, 6  ;;  %v425_v6 = vrot.slane %v2224_v7, 6 }
  0x89   :  { %v2230_v34 = vadd.f32 %v384_v36, %v2074_v11  ;;  %v2233_v14 = vadd.f32 %v385_v55, %v2077_v45  ;;  %v426_v49 = vrot.slane %v2238_v1, 6  ;;  %v427_v46 = vrot.slane %v2244_v31, 6  ;;  %v2250_v11 = vld [vmem:[%s2563_s1 + $0x90] sm:$0x3]  ;;  %v1312_v55 = vld [vmem:[%s2562_s0 + $0x28] sm:$0xff] }
  0x8a   :  { %v428_v45 = vrot.slane %v2250_v11, 6  ;;  %v429_v42 = vrot.slane %v2256_v50, 6  ;;  %v430_v48 = vrot.slane %v1575_v58, 6  ;;  %v444_v30 = vmul.f32 %v1307_v20, %v420_v21 }
  0x8b   :  { %v445_v38 = vmul.f32 %v1308_v57, %v421_v23  ;;  %v446_v52 = vmul.f32 %v1309_v37, %v422_v25  ;;  %v447_v58 = vmul.f32 %v1310_v53, %v423_v28  ;;  %v448_v36 = vmul.f32 %v1311_v63, %v424_v13  ;;  %v2281_v57 = vld [vmem:[%s2563_s1] sm:$0xff]  ;;  %v2287_v53 = vld [vmem:[%s2563_s1 + $0x8] sm:$0xff] }
  0x8c   :  { %v449_v20 = vmul.f32 %v1312_v55, %v425_v6  ;;  %2852 = vst [vmem:[#allocation40_spill] sm:$0xff] %v2281_v57  ;;  %v456_v37 = vmul.f32 %v2281_v57, %v420_v21  ;;  %2853 = vst [vmem:[#allocation41_spill] sm:$0xff] %v2287_v53  ;;  %v457_v32 = vmul.f32 %v2287_v53, %v421_v23  ;;  %v2293_v63 = vld [vmem:[%s2563_s1 + $0x20] sm:$0xff]  ;;  %v1325_v57 = vld [vmem:[%s2562_s0 + $0x50] sm:$0xff] }
  0x8d   :  { %2854 = vst [vmem:[#allocation43_spill] sm:$0xff] %v2293_v63  ;;  %v458_v55 = vmul.f32 %v2293_v63, %v422_v25  ;;  %v459_v21 = vmul.f32 %v2299_v35, %v423_v28  ;;  %v460_v23 = vmul.f32 %v2305_v12, %v424_v13  ;;  %v410_v60 = vadd.f32 %v386_v56, %v2080_v19  ;;  %v1318_v25 = vld [vmem:[%s2562_s0 + $0x30] sm:$0xff]  ;;  %v1321_v56 = vld [vmem:[%s2562_s0 + $0x38] sm:$0xff] }
  0x8e   :  { %v450_v47 = vmul.f32 %v1318_v25, %v426_v49  ;;  %v461_v28 = vmul.f32 %v2315_v8, %v425_v6  ;;  %v462_v13 = vmul.f32 %v2321_v41, %v426_v49  ;;  %v431_v19 = vrot.slane %v1609_v40, 6  ;;  %v1323_v40 = vld [vmem:[%s2562_s0 + $0x40] sm:$0xff] }
  0x8f   :  { %v451_v25 = vmul.f32 %v1321_v56, %v427_v46  ;;  %v463_v6 = vmul.f32 %v2331_v43, %v427_v46  ;;  %v468_v8 = vsub.f32 %v444_v30, %v456_v37  ;;  %v469_v12 = vsub.f32 %v445_v38, %v457_v32  ;;  %v1324_v56 = vld [vmem:[%s2562_s0 + $0x48] sm:$0xff]  ;;  %v2346_v32 = vld [vmem:[%s2563_s1 + $0x80] sm:$0xff] }
  0x90   :  { %v470_v35 = vsub.f32 %v446_v52, %v458_v55  ;;  %v471_v63 = vsub.f32 %v447_v58, %v459_v21  ;;  %v472_v53 = vsub.f32 %v448_v36, %v460_v23  ;;  %v452_v49 = vmul.f32 %v1323_v40, %v428_v45  ;;  %2859 = vst [vmem:[#allocation39_spill] sm:$0xff] %v2346_v32  ;;  %v2352_v52 = vld [vmem:[%s2563_s1 + $0x88] sm:$0xff]  ;;  %v1328_v23 = vld [vmem:[%s2562_s0 + $0x58] sm:$0xff] }
  0x91   :  { %v453_v41 = vmul.f32 %v1324_v56, %v429_v42  ;;  %v454_v46 = vmul.f32 %v1325_v57, %v430_v48  ;;  %v473_v30 = vsub.f32 %v449_v20, %v461_v28  ;;  %v464_v38 = vmul.f32 %v2346_v32, %v428_v45  ;;  %2860 = vst [vmem:[#allocation42_spill] sm:$0xff] %v2352_v52  ;;  %v2361_v45 = vld [vmem:[%s2563_s1 + $0xa0] sm:$0xff] }
  0x92   :  { %v465_v58 = vmul.f32 %v2352_v52, %v429_v42  ;;  %v474_v36 = vsub.f32 %v450_v47, %v462_v13  ;;  %v480_v37 = vmul.f32 %v468_v8, %v468_v8  ;;  %v481_v55 = vmul.f32 %v469_v12, %v469_v12  ;;  %2861 = vst [vmem:[#allocation46_spill] sm:$0xff] %v2361_v45 }
  0x93   :  { %v482_v21 = vmul.f32 %v470_v35, %v470_v35  ;;  %v483_v57 = vmul.f32 %v471_v63, %v471_v63  ;;  %v484_v20 = vmul.f32 %v472_v53, %v472_v53  ;;  %v455_v28 = vmul.f32 %v1328_v23, %v431_v19 }
  0x94   :  { %v466_v40 = vmul.f32 %v2361_v45, %v430_v48  ;;  %v467_v42 = vmul.f32 %v431_v19, %v2847_v5  ;;  %v475_v47 = vsub.f32 %v451_v25, %v463_v6  ;;  %v2862_v8 = vrot.slane %v2152_v2, 2 }
  0x95   :  { %v2863_v35 = vrot.slane %v2154_v29, 2  ;;  %v485_v63 = vmul.f32 %v473_v30, %v473_v30  ;;  %v504_v13 = vrot.slane %v480_v37, 3  ;;  %v476_v56 = vsub.f32 %v452_v49, %v464_v38 }
  0x96   :  { %v411_v12 = vadd.f32 %v2862_v8, %v2084_v39  ;;  %v505_v23 = vrot.slane %v481_v55, 3  ;;  %v506_v52 = vrot.slane %v482_v21, 3  ;;  %v507_v32 = vrot.slane %v483_v57, 3 }
  0x97   :  { %v412_v53 = vadd.f32 %v2863_v35, %v2139_v0  ;;  %v2864_v48 = vrot.slane %v2156_v54, 2  ;;  %v477_v5 = vsub.f32 %v453_v41, %v465_v58  ;;  %v486_v19 = vmul.f32 %v474_v36, %v474_v36 }
  0x98   :  { %v508_v25 = vrot.slane %v484_v20, 3  ;;  %v478_v6 = vsub.f32 %v454_v46, %v466_v40  ;;  %v479_v2 = vsub.f32 %v455_v28, %v467_v42  ;;  %v487_v39 = vmul.f32 %v475_v47, %v475_v47 }
  0x99   :  { %v413_v45 = vadd.f32 %v2864_v48, %v2142_v16  ;;  %v528_v8 = vadd.f32 %v504_v13, %v2230_v34  ;;  %v509_v29 = vrot.slane %v485_v63, 3  ;;  %v529_v0 = vadd.f32 %v505_v23, %v2233_v14 }
  0x9a   :  { %v530_v30 = vadd.f32 %v506_v52, %v410_v60  ;;  %v531_v49 = vadd.f32 %v507_v32, %v411_v12  ;;  %v395_v38 = vrot.slane %v2182_v59, 2  ;;  %v2865_v37 = vrot.slane %v2158_v4, 2 }
  0x9b   :  { %v2866_v16 = vrot.slane %v2169_v62, 2  ;;  %v488_v46 = vmul.f32 %v476_v56, %v476_v56  ;;  %v2867_v58 = vrot.slane %v2176_v44, 2  ;;  %v510_v36 = vrot.slane %v486_v19, 3 }
  0x9c   :  { %v414_v54 = vadd.f32 %v2865_v37, %v2145_v24  ;;  %v532_v55 = vadd.f32 %v508_v25, %v412_v53  ;;  %v540_v60 = vmul.f32 %v2193_v51, %v528_v8  ;;  %v489_v14 = vmul.f32 %v477_v5, %v477_v5  ;;  %v2419_v37 = vld [vmem:[%s2563_s1 + $0xb8] sm:$0x3] }
  0x9d   :  { %v415_v41 = vadd.f32 %v2866_v16, %v2148_v26  ;;  %v416_v34 = vadd.f32 %v2867_v58, %v2161_v3  ;;  %v490_v32 = vmul.f32 %v478_v6, %v478_v6  ;;  %v541_v59 = vmul.f32 %v2199_v61, %v529_v0 }
  0x9e   :  { %v542_v4 = vmul.f32 %v2205_v17, %v530_v30  ;;  %v491_v24 = vmul.f32 %v479_v2, %v479_v2  ;;  %v511_v52 = vrot.slane %v487_v39, 3  ;;  %v533_v21 = vadd.f32 %v509_v29, %v413_v45  ;;  %v2413_v30 = vld [vmem:[%s2563_s1 + $0xb0] sm:$0x3] }
  0x9f   :  { %v543_v26 = vmul.f32 %v2212_v22, %v531_v49  ;;  %v2868_v62 = vrot.slane %v2178_v9, 2  ;;  %v2869_v3 = vrot.slane %v2180_v18, 2  ;;  %v512_v20 = vrot.slane %v488_v46, 3 }
  0xa0   :  { %v1122_v28 = vsel %vm1020_vm0, %v540_v60, 0.0  ;;  %v534_v40 = vadd.f32 %v510_v36, %v414_v54  ;;  %v544_v42 = vmul.f32 %v2218_v27, %v532_v55  ;;  %v1123_v47 = vsel %vm1020_vm0, %v541_v59, 0.0  ;;  %v2870_v55 = vld [vmem:[#allocation54_spill] sm:$0xff]  ;;  %v2872_v59 = vld [vmem:[#allocation56_spill] sm:$0xff] }
  0xa1   :  { %v417_v44 = vadd.f32 %v2868_v62, %v2164_v10  ;;  %v418_v57 = vadd.f32 %v2869_v3, %v2167_v33  ;;  %v1125_v45 = vsel %vm1020_vm0, %v542_v4, 0.0  ;;  %v419_v12 = vadd.f32 %v395_v38, %v2174_v15  ;;  %v2876_v62 = vld [vmem:[#allocation58_spill] sm:$0xff] }
  0xa2   :  { %v513_v35 = vrot.slane %v489_v14, 3  ;;  %v514_v53 = vrot.slane %v490_v32, 3  ;;  %v1124_v9 = vadd.f32 %v1123_v47, %v1122_v28  ;;  %v515_v10 = vrot.slane %v491_v24, 3 }
  0xa3   :  { %v535_v63 = vadd.f32 %v511_v52, %v415_v41  ;;  %v545_v18 = vmul.f32 %v2224_v7, %v533_v21  ;;  %v1127_v33 = vsel %vm1020_vm0, %v543_v26, 0.0  ;;  %v536_v56 = vadd.f32 %v512_v20, %v416_v34  ;;  %v2874_v52 = vld [vmem:[#allocation57_spill] sm:$0xff]  ;;  %v2878_v20 = vld [vmem:[#allocation59_spill] sm:$0xff] }
  0xa4   :  { %v1126_v13 = vadd.f32 %v1125_v45, %v1124_v9  ;;  %v546_v23 = vmul.f32 %v2238_v1, %v534_v40  ;;  %v1129_v48 = vsel %vm1020_vm0, %v544_v42, 0.0  ;;  %v537_v5 = vadd.f32 %v513_v35, %v417_v44  ;;  %v2880_v42 = vld [vmem:[#allocation60_spill] sm:$0xff]  ;;  %v2884_v9 = vld [vmem:[#allocation62_spill] sm:$0xff] }
  0xa5   :  { %v538_v19 = vadd.f32 %v514_v53, %v418_v57  ;;  %v539_v6 = vadd.f32 %v515_v10, %v419_v12  ;;  %v547_v15 = vmul.f32 %v2244_v31, %v535_v63  ;;  %v1131_v2 = vsel %vm1020_vm0, %v545_v18, 0.0  ;;  %v2882_v12 = vld [vmem:[#allocation61_spill] sm:$0xff]  ;;  %v2886_v18 = vld [vmem:[#allocation63_spill] sm:$0xff] }
  0xa6   :  { %v1128_v25 = vadd.f32 %v1127_v33, %v1126_v13  ;;  %v548_v8 = vmul.f32 %v2250_v11, %v536_v56  ;;  %v1133_v29 = vsel %vm1020_vm0, %v546_v23, 0.0  ;;  %v549_v0 = vmul.f32 %v2256_v50, %v537_v5  ;;  %v2888_v56 = vld [vmem:[#allocation64_spill] sm:$0xff]  ;;  %v2890_v5 = vld [vmem:[#allocation65_spill] sm:$0xff] }
  0xa7   :  { %v550_v49 = vmul.f32 %v2413_v30, %v538_v19  ;;  %v551_v54 = vmul.f32 %v2419_v37, %v539_v6  ;;  %v1135_v16 = vsel %vm1020_vm0, %v547_v15, 0.0  ;;  %v2871_v60 = vmax.f32 %v2870_v55, -100.0  ;;  %v2892_v15 = vld [vmem:[#allocation66_spill] sm:$0xff] }
  0xa8   :  { %v1130_v39 = vadd.f32 %v1129_v48, %v1128_v25  ;;  %v1137_v46 = vsel %vm1020_vm0, %v548_v8, 0.0  ;;  %v1139_v34 = vsel %vm1020_vm0, %v549_v0, 0.0  ;;  %v2873_v4 = vmax.f32 %v2872_v59, -100.0  ;;  %v2894_v8 = vld [vmem:[#allocation40_spill] sm:$0xff] }
  0xa9   :  { %v1141_v36 = vsel %vm1020_vm0, %v550_v49, 0.0  ;;  %v816_v14 = vrot.slane %v2871_v60, 1  ;;  %v1143_v32 = vsel %vm1020_vm0, %v551_v54, 0.0  ;;  %v2875_v21 = vmax.f32 %v2874_v52, -100.0  ;;  %v2895_v49 = vld [vmem:[#allocation41_spill] sm:$0xff]  ;;  %v2896_v54 = vld [vmem:[#allocation43_spill] sm:$0xff] }
  0xaa   :  { %v1132_v38 = vadd.f32 %v1131_v2, %v1130_v39  ;;  %v817_v24 = vrot.slane %v2873_v4, 1  ;;  %v2877_v44 = vmax.f32 %v2876_v62, -100.0  ;;  %v2879_v28 = vmax.f32 %v2878_v20, -100.0  ;;  %v2900_v4 = vld [vmem:[#allocation68_spill] sm:$0xff] }
  0xab   :  { %v818_v26 = vrot.slane %v2875_v21, 1  ;;  %v2881_v47 = vmax.f32 %v2880_v42, -100.0  ;;  %v2883_v35 = vmax.f32 %v2882_v12, -100.0  ;;  %v2885_v10 = vmax.f32 %v2884_v9, -100.0  ;;  %v2902_v21 = vld [vmem:[#allocation69_spill] sm:$0xff]  ;;  %v2906_v12 = vld [vmem:[#allocation52_spill] sm:$0xff] }
  0xac   :  { %v1134_v41 = vadd.f32 %v1133_v29, %v1132_v38  ;;  %v819_v3 = vrot.slane %v2877_v44, 1  ;;  %v820_v40 = vrot.slane %v2879_v28, 1  ;;  %v2887_v33 = vmax.f32 %v2886_v18, -100.0 }
  0xad   :  { %v821_v45 = vrot.slane %v2881_v47, 1  ;;  %v822_v53 = vrot.slane %v2883_v35, 1  ;;  %v823_v63 = vrot.slane %v2885_v10, 1  ;;  %v2889_v23 = vmax.f32 %v2888_v56, -100.0  ;;  %v2907_v10 = vld [vmem:[#allocation53_spill] sm:$0xff] }
  0xae   :  { %v1136_v58 = vadd.f32 %v1135_v16, %v1134_v41  ;;  %v824_v13 = vrot.slane %v2887_v33, 1  ;;  %v2891_v19 = vmax.f32 %v2890_v5, -100.0  ;;  %v2893_v2 = vmax.f32 %v2892_v15, -100.0  ;;  %v2897_v41 = vld [vmem:[#allocation44_spill] sm:$0xff]  ;;  %v2908_v33 = vld [vmem:[#allocation71_spill] sm:$0xff] }
  0xaf   :  { %v825_v48 = vrot.slane %v2889_v23, 1  ;;  %v840_v29 = vmul.f32 %v2894_v8, %v816_v14  ;;  %v852_v0 = vsub.f32 1.0, %v2894_v8  ;;  %v853_v38 = vsub.f32 1.0, %v2895_v49  ;;  %v2911_v15 = vld [vmem:[#allocation72_spill] sm:$0xff] }
  0xb0   :  { %v1138_v57 = vadd.f32 %v1137_v46, %v1136_v58  ;;  %v2449_v25 = vrot.slane %v2891_v19, 1  ;;  %v2453_v39 = vrot.slane %v2893_v2, 1  ;;  %v854_v16 = vsub.f32 1.0, %v2896_v54  ;;  %v2898_v58 = vld [vmem:[#allocation67_spill] sm:$0xff] }
  0xb1   :  { %v855_v46 = vsub.f32 1.0, %v2897_v41  ;;  %v2899_v55 = vmax.f32 %v2898_v58, -100.0  ;;  %v2903_v62 = vmax.f32 %v2902_v21, -100.0  ;;  %v841_v28 = vmul.f32 %v2895_v49, %v817_v24  ;;  %v2910_v19 = vld [vmem:[#allocation55_spill] sm:$0xff] }
  0xb2   :  { %v1140_v6 = vadd.f32 %v1139_v34, %v1138_v57  ;;  %v2901_v34 = vmax.f32 %v2900_v4, -100.0  ;;  %v2904_v57 = vld [vmem:[#allocation70_spill] sm:$0xff]  ;;  %v842_v42 = vmul.f32 %v2896_v54, %v818_v26  ;;  %v843_v47 = vmul.f32 %v2897_v41, %v819_v3  ;;  %v2913_v26 = vld [vmem:[#allocation73_spill] sm:$0xff]  ;;  %v2915_v58 = vld [vmem:[#allocation39_spill] sm:$0xff] }
  0xb3   :  { %v864_v60 = vrot.slane %v2899_v55, 1  ;;  %v866_v44 = vrot.slane %v2903_v62, 1  ;;  %v2905_v14 = vmax.f32 %v2904_v57, -100.0  ;;  %v844_v35 = vmul.f32 %v2906_v12, %v820_v40  ;;  %v2917_v62 = vld [vmem:[#allocation74_spill] sm:$0xff] }
  0xb4   :  { %v1142_v59 = vadd.f32 %v1141_v36, %v1140_v6  ;;  %v865_v52 = vrot.slane %v2901_v34, 1  ;;  %v845_v36 = vmul.f32 %v2907_v10, %v821_v45  ;;  %v856_v18 = vsub.f32 1.0, %v2906_v12 }
  0xb5   :  { %v867_v20 = vrot.slane %v2905_v14, 1  ;;  %v2909_v56 = vmax.f32 %v2908_v33, -100.0  ;;  %v857_v5 = vsub.f32 1.0, %v2907_v10  ;;  %v858_v6 = vsub.f32 1.0, %v2910_v19  ;;  %v2922_v33 = vld [vmem:[#allocation76_spill] sm:$0xff] }
  0xb6   :  { %v1144_v9 = vadd.f32 %v1143_v32, %v1142_v59  ;;  %v2912_v24 = vmax.f32 %v2911_v15, -100.0  ;;  %v2914_v8 = vmax.f32 %v2913_v26, -100.0  ;;  %v888_v40 = vmul.f32 %v864_v60, %v852_v0  ;;  %v2916_v59 = vld [vmem:[#allocation42_spill] sm:$0xff]  ;;  %v2919_v0 = vld [vmem:[#allocation75_spill] sm:$0xff] }
  0xb7   :  { %v868_v23 = vrot.slane %v2909_v56, 1  ;;  %v889_v32 = vmul.f32 %v865_v52, %v853_v38  ;;  %v890_v49 = vmul.f32 %v866_v44, %v854_v16  ;;  %v891_v45 = vmul.f32 %v867_v20, %v855_v46  ;;  %v2921_v20 = vld [vmem:[#allocation46_spill] sm:$0xff] }
  0xb8   :  { %v869_v2 = vrot.slane %v2912_v24, 1  ;;  %v870_v3 = vrot.slane %v2914_v8, 1  ;;  %1145 = vadd.xlane.f32.xlu1 %v1144_v9  ;;  %v846_v54 = vmul.f32 %v2910_v19, %v822_v53  ;;  %v847_v41 = vmul.f32 %v2331_v43, %v823_v63  ;;  %v1332_v9 = vld [vmem:[%s2563_s1 + $0xa8] sm:$0xff] }
  0xb9   :  { %v848_v55 = vmul.f32 %v2915_v58, %v824_v13  ;;  %v849_v4 = vmul.f32 %v2916_v59, %v825_v48  ;;  %v859_v34 = vsub.f32 1.0, %v2331_v43  ;;  %v860_v21 = vsub.f32 1.0, %v2915_v58 }
  0xba   :  { %v2918_v57 = vmax.f32 %v2917_v62, -100.0  ;;  %v892_v12 = vmul.f32 %v868_v23, %v856_v18  ;;  %v2920_v38 = vmax.f32 %v2919_v0, -100.0  ;;  %v893_v46 = vmul.f32 %v869_v2, %v857_v5  ;;  %v2924_v5 = vld [vmem:[#allocation77_spill] sm:$0xff] }
  0xbb   :  { %v894_v60 = vmul.f32 %v870_v3, %v858_v6  ;;  %v924_v53 = vlaneseq  ;;  %v900_v52 = vadd.f32 %v888_v40, %v840_v29  ;;  %v901_v63 = vadd.f32 %v889_v32, %v841_v28 }
  0xbc   :  { %v871_v14 = vrot.slane %v2918_v57, 1  ;;  %v872_v16 = vrot.slane %v2920_v38, 1  ;;  %v902_v44 = vadd.f32 %v890_v49, %v842_v42  ;;  %v903_v13 = vadd.f32 %v891_v45, %v843_v47 }
  0xbd   :  { %v861_v48 = vsub.f32 1.0, %v2916_v59  ;;  %v862_v43 = vsub.f32 1.0, %v2921_v20  ;;  %v863_v10 = vsub.f32 1.0, %v1332_v9  ;;  %v2497_v18 = vshrl.u32 %v924_v53, 7 }
  0xbe   :  { %v2923_v56 = vmax.f32 %v2922_v33, -100.0  ;;  %v2925_v19 = vmax.f32 %v2924_v5, -100.0  ;;  %v895_v28 = vmul.f32 %v871_v14, %v859_v34  ;;  %v904_v42 = vadd.f32 %v892_v12, %v844_v35 }
  0xbf   :  { %v896_v47 = vmul.f32 %v872_v16, %v860_v21  ;;  %v905_v6 = vadd.f32 %v893_v46, %v845_v36  ;;  %v906_v15 = vadd.f32 %v894_v60, %v846_v54  ;;  %v2504_v24 = vsub.s32 0, %v2497_v18  ;;  %v2926_v36 = vld [vmem:[#allocation78_spill] sm:$0xff] }
  0xc0   :  { %v873_v23 = vrot.slane %v2923_v56, 1  ;;  %v874_v29 = vrot.slane %v2925_v19, 1  ;;  %v912_v2 = vsub.f32 0.0, %v900_v52  ;;  %v913_v26 = vsub.f32 0.0, %v901_v63 }
  0xc1   :  { %v914_v8 = vsub.f32 0.0, %v902_v44  ;;  %v915_v3 = vsub.f32 0.0, %v903_v13  ;;  %v927_v40 = vrot.slane %v2193_v51, %v2504_v24  ;;  %v931_v32 = vrot.slane %v2199_v61, %v2504_v24 }
  0xc2   :  { %v935_v49 = vrot.slane %v2205_v17, %v2504_v24  ;;  %v939_v35 = vrot.slane %v2212_v22, %v2504_v24  ;;  %v2927_v45 = vmax.f32 %v2926_v36, -100.0  ;;  %v897_v58 = vmul.f32 %v873_v23, %v861_v48 }
  0xc3   :  { %v916_v59 = vsub.f32 0.0, %v904_v42  ;;  %v943_v34 = vrot.slane %v2218_v27, %v2504_v24  ;;  %v850_v51 = vmul.f32 %v2921_v20, %v2449_v25  ;;  %v907_v21 = vadd.f32 %v895_v28, %v847_v41 }
  0xc4   :  { %v875_v54 = vrot.slane %v2927_v45, 1  ;;  %v917_v62 = vsub.f32 0.0, %v905_v6  ;;  %v947_v61 = vrot.slane %v2224_v7, %v2504_v24  ;;  %v972_v17 = vmul.f32 %v927_v40, %v912_v2 }
  0xc5   :  { %v973_v57 = vmul.f32 %v931_v32, %v913_v26  ;;  %v974_v14 = vmul.f32 %v935_v49, %v914_v8  ;;  %v975_v22 = vmul.f32 %v939_v35, %v915_v3  ;;  %v898_v12 = vmul.f32 %v874_v29, %v862_v43 }
  0xc6   :  { %v908_v0 = vadd.f32 %v896_v47, %v848_v55  ;;  %v918_v38 = vsub.f32 0.0, %v906_v15  ;;  %v951_v16 = vrot.slane %v2238_v1, %v2504_v24  ;;  %v851_v27 = vmul.f32 %v1332_v9, %v2453_v39 }
  0xc7   :  { %v899_v46 = vmul.f32 %v875_v54, %v863_v10  ;;  %v909_v60 = vadd.f32 %v897_v58, %v849_v4  ;;  %v976_v25 = vmul.f32 %v943_v34, %v916_v59  ;;  %v1065_v41 = vrot.slane %v972_v17, 4 }
  0xc8   :  { %v1066_v53 = vrot.slane %v973_v57, 4  ;;  %v1067_v52 = vrot.slane %v974_v14, 4  ;;  %v919_v7 = vsub.f32 0.0, %v907_v21  ;;  %v955_v63 = vrot.slane %v2244_v31, %v2504_v24 }
  0xc9   :  { %v977_v44 = vmul.f32 %v947_v61, %v917_v62  ;;  %v1068_v13 = vrot.slane %v975_v22, 4  ;;  %v910_v55 = vadd.f32 %v898_v12, %v850_v51  ;;  %v920_v48 = vsub.f32 0.0, %v908_v0 }
  0xca   :  { %v959_v1 = vrot.slane %v2250_v11, %v2504_v24  ;;  %v978_v20 = vmul.f32 %v951_v16, %v918_v38  ;;  %v1069_v39 = vrot.slane %v976_v25, 4  ;;  %v1090_v4 = vsel %vm1089_vm1, %v1065_v41, 0.0 }
  0xcb   :  { %v1091_v43 = vsel %vm1089_vm1, %v1066_v53, 0.0  ;;  %v1093_v9 = vsel %vm1089_vm1, %v1067_v52, 0.0  ;;  %v911_v10 = vadd.f32 %v899_v46, %v851_v27  ;;  %v921_v33 = vsub.f32 0.0, %v909_v60 }
  0xcc   :  { %v1092_v56 = vadd.f32 %v1091_v43, %v1090_v4  ;;  %v963_v31 = vrot.slane %v2256_v50, %v2504_v24  ;;  %v979_v23 = vmul.f32 %v955_v63, %v919_v7  ;;  %v1070_v5 = vrot.slane %v977_v44, 4 }
  0xcd   :  { %v1095_v19 = vsel %vm1089_vm1, %v1068_v13, 0.0  ;;  %v922_v29 = vsub.f32 0.0, %v910_v55  ;;  %v967_v28 = vrot.slane %v2413_v30, %v2504_v24  ;;  %v980_v42 = vmul.f32 %v959_v1, %v920_v48 }
  0xce   :  { %v1094_v11 = vadd.f32 %v1093_v9, %v1092_v56  ;;  %v1071_v47 = vrot.slane %v978_v20, 4  ;;  %v1097_v6 = vsel %vm1089_vm1, %v1069_v39, 0.0  ;;  %v923_v15 = vsub.f32 0.0, %v911_v10 }
  0xcf   :  { %v971_v26 = vrot.slane %v2419_v37, %v2504_v24  ;;  %v981_v8 = vmul.f32 %v963_v31, %v921_v33  ;;  %v1072_v50 = vrot.slane %v979_v23, 4  ;;  %v1099_v3 = vsel %vm1089_vm1, %v1070_v5, 0.0 }
  0xd0   :  { %v1096_v2 = vadd.f32 %v1095_v19, %v1094_v11  ;;  %v982_v32 = vmul.f32 %v967_v28, %v922_v29  ;;  %v1073_v49 = vrot.slane %v980_v42, 4  ;;  %v1101_v35 = vsel %vm1089_vm1, %v1071_v47, 0.0 }
  0xd1   :  { %v983_v30 = vmul.f32 %v971_v26, %v923_v15  ;;  %v1074_v45 = vrot.slane %v981_v8, 4  ;;  %v1103_v54 = vsel %vm1089_vm1, %v1072_v50, 0.0  ;;  %vm1156_vm2 = vcmp.eq.s32.totalorder %v2497_v18, 0 }
  0xd2   :  { %v1098_v40 = vadd.f32 %v1097_v6, %v1096_v2  ;;  %v1075_v59 = vrot.slane %v982_v32, 4  ;;  %v1105_v34 = vsel %vm1089_vm1, %v1073_v49, 0.0  ;;  %vm1159_vm3 = vcmp.eq.s32.totalorder %v2497_v18, 1 }
  0xd3   :  { %v1076_v37 = vrot.slane %v983_v30, 4  ;;  %v1107_v24 = vsel %vm1089_vm1, %v1074_v45, 0.0  ;;  %vm1163_vm4 = vcmp.eq.s32.totalorder %v2497_v18, 2 }
  0xd4   :  { %v1100_v36 = vadd.f32 %v1099_v3, %v1098_v40  ;;  %v1109_v62 = vsel %vm1089_vm1, %v1075_v59, 0.0 }
  0xd5   :  { %v1111_v17 = vsel %vm1089_vm1, %v1076_v37, 0.0 }
  0xd6   :  { %v1102_v58 = vadd.f32 %v1101_v35, %v1100_v36 }
  0xd8   :  { %v1104_v51 = vadd.f32 %v1103_v54, %v1102_v58 }
  0xda   :  { %v1106_v21 = vadd.f32 %v1105_v34, %v1104_v51 }
  0xdc   :  { %v1108_v61 = vadd.f32 %v1107_v24, %v1106_v21 }
  0xde   :  { %v1110_v57 = vadd.f32 %v1109_v62, %v1108_v61 }
  0xe0   :  { %v1112_v14 = vadd.f32 %v1111_v17, %v1110_v57 }
  0xe2   :  { %1113 = vadd.xlane.f32.xlu0 %v1112_v14 }
 0x101   :  { %v1045_v22 = vpop.xlane.xlu0 %1044 }
 0x102   :  { %v1046_v12 = vrot.slane %v1045_v22, 4 }
 0x104   :  { %v1047_v0 = vadd.f32 %v1046_v12, %v1045_v22 }
 0x106   :  { %v1048_v38 = vrot.slane %v1047_v0, 2 }
 0x108   :  { %v1049_v16 = vadd.f32 %v1048_v38, %v1047_v0 }
 0x10a   :  { %v1050_v27 = vrot.slane %v1049_v16, 1 }
 0x10c   :  { %v1051_v46 = vadd.f32 %v1050_v27, %v1049_v16 }
 0x10e   :  { %1194 = vpush %v1051_v46 }
 0x13f   :  { %s1195_s1 = spop %1194 }
 0x140   :  { %v1157_v4 = vstv %s1195_s1 }
 0x141   :  { %v1158_v9 = vsel %vm1156_vm2, %v1157_v4, 0.0 }
 0x145   :  { %v1146_v60 = vpop.xlane.xlu1 %1145 }
 0x146   :  { %v1147_v25 = vrot.slane %v1146_v60, 4 }
 0x148   :  { %v1148_v41 = vadd.f32 %v1147_v25, %v1146_v60 }
 0x14a   :  { %v1149_v52 = vrot.slane %v1148_v41, 2 }
 0x14c   :  { %v1150_v44 = vadd.f32 %v1149_v52, %v1148_v41 }
 0x14e   :  { %v1151_v48 = vrot.slane %v1150_v44, 1 }
 0x150   :  { %v1152_v39 = vadd.f32 %v1151_v48, %v1150_v44 }
 0x16f   :  { %v1114_v53 = vpop.xlane.xlu0 %1113 }
 0x170   :  { %v1115_v7 = vrot.slane %v1114_v53, 4 }
 0x172   :  { %v1116_v63 = vadd.f32 %v1115_v7, %v1114_v53 }
 0x174   :  { %v1117_v13 = vrot.slane %v1116_v63, 2 }
 0x176   :  { %v1118_v55 = vadd.f32 %v1117_v13, %v1116_v63 }
 0x178   :  { %v1119_v1 = vrot.slane %v1118_v55, 1 }
 0x17a   :  { %v1120_v20 = vadd.f32 %v1119_v1, %v1118_v55 }
 0x17c   :  { %1196 = vpush %v1120_v20 }
 0x17d   :  { %1198 = vpush %v1152_v39 }
 0x1ad   :  { %s1197_s12 = spop %1196 }
 0x1ae   :  { %s1199_s13 = spop %1198  ;;  %v1160_v43 = vstv %s1197_s12 }
 0x1af   :  { %v1161_v10 = vsel %vm1159_vm3, %v1160_v43, 0.0  ;;  %v1164_v33 = vstv %s1199_s13 }
 0x1b0   :  { %v1162_v56 = vadd.f32 %v1161_v10, %v1158_v9  ;;  %v1165_v31 = vsel %vm1163_vm4, %v1164_v33, 0.0 }
 0x1b2   :  { %v1166_v23 = vadd.f32 %v1165_v31, %v1162_v56 }
 0x1b4   :  { %1167 = vst [vmem:[#allocation2] sm:$0xff] %v1166_v23 }
 0x1b5   :  { %1344 = shalt.err (!%p1341_p4)
}
 0x1b6   :  { %s1345_s19 = scalar_lea.hbm %s2564_s2, 128 }
 0x1b7   :  { %p1346_p5 = scmp.ne.s32.totalorder %s2564_s2, %s1345_s19  ;;  %p1349_p6 = scmp.lt.u32.totalorder %s1345_s19, %s2564_s2 }
 0x1b9   :  { %p1351_p7 = pnand %p1349_p6, %p1346_p5 }
 0x1bb   :  { %1354 = shalt.err (!%p1351_p7)
}
 0x1bc   :  { %1177 = dma.vmem_to_hbm [thread:$0]  %s1175_s15, 128, %s2564_s2, [#allocation3]  }
 0x1bd   :  { %1355 = dma.done.wait [#allocation3], 128  }
 0x1be   :  { %1356 = vsyncadd [#allocation3], 4294967168 }
 0x1bf   :  { %1181 = vsyncpa [#allocation3], 1 }

</bundles_post_ra>
